<compile_context>
chip_gen: v7x
topology: tpu7x:2x2x1
jax: 0.10.0
libtpu: 0.0.40
codegen_flags: <defaults>
</compile_context>

<pallas_src>
import functools
import math

import jax
import jax.numpy as jnp
import numpy as np
from jax.experimental import pallas as pl
from jax.experimental.pallas import tpu as pltpu

# ---------------- config (small, consistent with the module) ----------------
D_MODEL    = 32
NHEAD      = 4
GROUPS     = 2
HEAD_DIM   = D_MODEL // NHEAD          # 8
HPG        = NHEAD // GROUPS           # heads per group = 2
NUM_LAYERS = 2
D_FF       = 4 * D_MODEL               # d_ff=None path -> 4*d_model = 128
VOCAB      = 64
BATCH      = 2
SEQ        = 8
M_TOKENS   = BATCH * SEQ
RMS_EPS    = 1.1920928955078125e-07    # torch.finfo(float32).eps (nn.RMSNorm eps=None)
KV_DIM     = GROUPS * HEAD_DIM         # 16
PROJ_COLS  = D_MODEL + 2 * KV_DIM + D_MODEL + KV_DIM   # q|k|v|q_neg|k_neg = 112

# ---- packed weight slab (bf16, D_MODEL rows), 128-aligned column slots ----
W_PROJ_OFF   = 0                        # 112 cols used
W_FFIN_OFF   = 128                      # 256 cols
W_FFOUT_OFF  = 384                      # 128 cols (ff_out stored transposed)
W_OW_OFF     = 512                      # 32 cols
W_LAYER_COLS = 640
OUT_PAD      = 128                      # vocab padded -> lane-dense final matmul/store
W_GLOBAL_OFF = NUM_LAYERS * W_LAYER_COLS
W_TOTAL_COLS = W_GLOBAL_OFF + OUT_PAD   # 1408

# ---- packed vector slab (f32): one row per bias/norm vector, 256 columns ----
V_COLS = 2 * D_FF                       # 256
V_NORM1, V_PROJB, V_OB, V_NORM2, V_FFINB, V_FFOUTB = range(6)
V_LAYER_ROWS = 6
V_GLOBAL_ROW = NUM_LAYERS * V_LAYER_ROWS
V_TOTAL_ROWS = V_GLOBAL_ROW + 2         # + final norm_w, padded out_b


# ------------------------------ fused kernel ------------------------------

def _llama_fwd_kernel(x_ref, tab_ref, w_ref, vec_ref, o_ref):
    M = x_ref.shape[0]                                 # B*S flattened tokens
    x = x_ref[...]                                     # (M, D_MODEL) f32
    cos_q = tab_ref[:, 0:D_MODEL]                      # (M, 32) batch-indexed angles
    sin_q = tab_ref[:, D_MODEL:2 * D_MODEL]            # (M, 32)
    mask  = tab_ref[:, 2 * D_MODEL:2 * D_MODEL + M]    # (M, M) additive bias (0 / -1e30)
    cos_k = cos_q[:, :KV_DIM]                          # per-head pattern repeats -> reuse
    sin_k = sin_q[:, :KV_DIM]

    def rmsnorm(h, w):                                 # h: (M, D) f32, w: (1, D) f32
        ms = jnp.mean(h * h, axis=-1, keepdims=True)
        return h * jax.lax.rsqrt(ms + RMS_EPS) * w

    for l in range(NUM_LAYERS):                        # static unroll; weights resident in VMEM
        wb = l * W_LAYER_COLS
        vb = l * V_LAYER_ROWS
        n1       = vec_ref[vb + V_NORM1:  vb + V_NORM1  + 1, :D_MODEL]
        proj_b   = vec_ref[vb + V_PROJB:  vb + V_PROJB  + 1, :PROJ_COLS]
        o_b      = vec_ref[vb + V_OB:     vb + V_OB     + 1, :D_MODEL]
        n2       = vec_ref[vb + V_NORM2:  vb + V_NORM2  + 1, :D_MODEL]
        ff_in_b  = vec_ref[vb + V_FFINB:  vb + V_FFINB  + 1, :2 * D_FF]
        ff_out_b = vec_ref[vb + V_FFOUTB: vb + V_FFOUTB + 1, :D_MODEL]

        proj_w    = w_ref[:, wb + W_PROJ_OFF:  wb + W_PROJ_OFF  + PROJ_COLS]   # bf16 (32,112)
        ff_in_w   = w_ref[:, wb + W_FFIN_OFF:  wb + W_FFIN_OFF  + 2 * D_FF]    # bf16 (32,256)
        ff_out_wT = w_ref[:, wb + W_FFOUT_OFF: wb + W_FFOUT_OFF + D_FF]        # bf16 (32,128)
        o_w       = w_ref[:, wb + W_OW_OFF:    wb + W_OW_OFF    + D_MODEL]     # bf16 (32,32)

        # ---------------- attention sub-block ----------------
        h = rmsnorm(x, n1)
        # One fused projection: q (scaled) | k | v | neg_half(q) (scaled) | neg_half(k)
        qkv = jnp.dot(h.astype(jnp.bfloat16), proj_w,
                      preferred_element_type=jnp.float32) + proj_b             # (M, 112) f32
        q     = qkv[:, 0:D_MODEL]
        k     = qkv[:, D_MODEL:D_MODEL + KV_DIM]
        v     = qkv[:, D_MODEL + KV_DIM:D_MODEL + 2 * KV_DIM]
        q_neg = qkv[:, D_MODEL + 2 * KV_DIM:2 * D_MODEL + 2 * KV_DIM]
        k_neg = qkv[:, 2 * D_MODEL + 2 * KV_DIM:PROJ_COLS]

        # Full-width RoPE: x*cos + neg_half(x)*sin (neg_half + softmax scale folded into weights).
        q_rot = (q * cos_q + q_neg * sin_q).astype(jnp.bfloat16)               # (M, 32)
        k_rot = (k * cos_k + k_neg * sin_k).astype(jnp.bfloat16)               # (M, 16)
        v_bf  = v.astype(jnp.bfloat16)

        heads = []
        for hh in range(NHEAD):
            g = hh // HPG
            qh = q_rot[:, hh * HEAD_DIM:(hh + 1) * HEAD_DIM]                   # (M, 8)
            kg = k_rot[:, g * HEAD_DIM:(g + 1) * HEAD_DIM]                     # (M, 8)
            vh = v_bf[:, g * HEAD_DIM:(g + 1) * HEAD_DIM]                      # (M, 8)
            # single K=8 contraction per head; scale already folded into q
            s = jax.lax.dot_general(qh, kg, (((1,), (1,)), ((), ())),
                                    preferred_element_type=jnp.float32) + mask # (M, M)
            m = jnp.max(s, axis=-1, keepdims=True)
            p = jnp.exp(s - m)
            denom = jnp.sum(p, axis=-1, keepdims=True)
            attn = p * pl.reciprocal(denom, approx=False)                      # exact (tiny tensor)
            # TODO(synk): attention dropout_p=0.1 is stochastic; treated as identity (eval).
            heads.append(jnp.dot(attn.astype(jnp.bfloat16), vh,
                                 preferred_element_type=jnp.float32))          # (M, 8)

        attn_out = jnp.concatenate(heads, axis=-1)                              # (M, 32)
        attn_proj = jnp.dot(attn_out.astype(jnp.bfloat16), o_w,
                            preferred_element_type=jnp.float32) + o_b           # single o-proj
        x = x + attn_proj

        # ---------------- SwiGLU feed-forward ----------------
        h2 = rmsnorm(x, n2)
        ff = jnp.dot(h2.astype(jnp.bfloat16), ff_in_w,
                     preferred_element_type=jnp.float32) + ff_in_b              # (M, 256)
        u = ff[:, :D_FF]
        vgate = ff[:, D_FF:]
        gate = u * (vgate * jax.nn.sigmoid(vgate))                              # SiLU gate, f32
        ffo = jax.lax.dot_general(gate.astype(jnp.bfloat16), ff_out_wT,
                                  (((1,), (1,)), ((), ())),
                                  preferred_element_type=jnp.float32) + ff_out_b
        x = x + ffo

    # ---------------- final norm + output projection (lane-dense, 128-wide) ----------------
    norm_w = vec_ref[V_GLOBAL_ROW:V_GLOBAL_ROW + 1, :D_MODEL]
    out_b  = vec_ref[V_GLOBAL_ROW + 1:V_GLOBAL_ROW + 2, :OUT_PAD]
    out_w  = w_ref[:, W_GLOBAL_OFF:W_GLOBAL_OFF + OUT_PAD]
    xn = rmsnorm(x, norm_w)
    o_ref[...] = (jnp.dot(xn.astype(jnp.bfloat16), out_w,
                          preferred_element_type=jnp.float32) + out_b).astype(o_ref.dtype)


def fused_llama(x, tab, w_slab, v_slab):
    """x: (B*S, D_MODEL) f32 embedded tokens -> (B*S, VOCAB) logits, one kernel launch."""
    M = x.shape[0]
    out = pl.pallas_call(
        _llama_fwd_kernel,
        out_shape=jax.ShapeDtypeStruct((M, OUT_PAD), jnp.float32),
        grid=(1,),
        in_specs=[
            pl.BlockSpec(x.shape, lambda i: (0, 0)),
            pl.BlockSpec(tab.shape, lambda i: (0, 0)),
            pl.BlockSpec(w_slab.shape, lambda i: (0, 0)),
            pl.BlockSpec(v_slab.shape, lambda i: (0, 0)),
        ],
        out_specs=pl.BlockSpec((M, OUT_PAD), lambda i: (0, 0)),
        compiler_params=pltpu.CompilerParams(dimension_semantics=("arbitrary",)),
    )(x, tab, w_slab, v_slab)
    return out[:, :VOCAB]


# ------------------------------ host-side packing ------------------------------

def _neg_half_perm(width):
    """P such that (x @ P)[:, c] == -x[:, c+d/2] (first half) / x[:, c-d/2] (second half),
    block-diagonal per head.  Applied to the projection weights so neg_half comes out
    of the fused matmul for free."""
    d2 = HEAD_DIM // 2
    P = np.zeros((width, width), np.float32)
    for c in range(width):
        r = c % HEAD_DIM
        if r < d2:
            P[c + d2, c] = -1.0
        else:
            P[c - d2, c] = 1.0
    return jnp.asarray(P)


def _vrow(vec):
    return jnp.pad(vec, ((0, 0), (0, V_COLS - vec.shape[1])))


def pack_params(p):
    scale = 1.0 / math.sqrt(HEAD_DIM)
    Pq = _neg_half_perm(D_MODEL)
    Pk = _neg_half_perm(KV_DIM)

    w_blocks, v_rows = [], []
    for l in range(NUM_LAYERS):
        qw = p['q_w'][l] * scale
        qb = p['q_b'][l] * scale            # fold sdpa scale into q path (incl. its neg-half)
        kw, kb = p['k_w'][l], p['k_b'][l]
        vw, vb = p['v_w'][l], p['v_b'][l]
        proj_w = jnp.concatenate([qw, kw, vw, qw @ Pq, kw @ Pk], axis=1)   # (32, 112)
        proj_b = jnp.concatenate([qb, kb, vb, qb @ Pq, kb @ Pk], axis=1)   # (1, 112)

        blk = jnp.zeros((D_MODEL, W_LAYER_COLS), jnp.float32)
        blk = blk.at[:, W_PROJ_OFF:W_PROJ_OFF + PROJ_COLS].set(proj_w)
        blk = blk.at[:, W_FFIN_OFF:W_FFIN_OFF + 2 * D_FF].set(p['ff_in_w'][l])
        blk = blk.at[:, W_FFOUT_OFF:W_FFOUT_OFF + D_FF].set(p['ff_out_w'][l].T)
        blk = blk.at[:, W_OW_OFF:W_OW_OFF + D_MODEL].set(p['o_w'][l])
        w_blocks.append(blk)

        v_rows += [_vrow(p['norm1_w'][l]), _vrow(proj_b), _vrow(p['o_b'][l]),
                   _vrow(p['norm2_w'][l]), _vrow(p['ff_in_b'][l]), _vrow(p['ff_out_b'][l])]

    out_w_pad = jnp.zeros((D_MODEL, OUT_PAD), jnp.float32).at[:, :VOCAB].set(p['out_w'])
    out_b_pad = jnp.zeros((1, OUT_PAD), jnp.float32).at[:, :VOCAB].set(p['out_b'])
    w_slab = jnp.concatenate(w_blocks + [out_w_pad], axis=1).astype(jnp.bfloat16)  # (32, 1408)
    v_rows += [_vrow(p['norm_w']), _vrow(out_b_pad)]
    v_slab = jnp.concatenate(v_rows, axis=0)                                        # (14, 256) f32

    # RoPE tables (angle indexed by BATCH index -- faithful to the reference) + additive mask.
    theta = 1.0 / (10000.0 ** (np.arange(0, HEAD_DIM, 2, dtype=np.float32) / HEAD_DIM))
    per_head = np.concatenate([theta, theta])                    # (8,)  cos/sin halves equal
    full = np.tile(per_head, NHEAD)                              # (32,) replicated per head
    bidx = (np.arange(M_TOKENS) // SEQ).astype(np.float32)       # batch index of each token row
    ang = bidx[:, None] * full[None, :]
    cos_q = np.cos(ang).astype(np.float32)
    sin_q = np.sin(ang).astype(np.float32)
    row = np.arange(M_TOKENS)[:, None]
    col = np.arange(M_TOKENS)[None, :]
    valid = ((row // SEQ) == (col // SEQ)) & ((col % SEQ) <= (row % SEQ))
    mask = np.where(valid, 0.0, -1e30).astype(np.float32)        # diag always unmasked
    tab = jnp.asarray(np.concatenate([cos_q, sin_q, mask], axis=1))   # (M, 64 + M)

    return {'emb': p['emb'], 'tab': tab, 'w_slab': w_slab, 'v_slab': v_slab}


# ------------------------------ model wiring ------------------------------

def llama_forward(tokens, packed):
    B, S = tokens.shape
    # TODO(synk): input_embedding not provided; assume lookup * sqrt(d_model). Dropout = identity (eval).
    x = (packed['emb'][tokens] * math.sqrt(D_MODEL)).reshape(B * S, D_MODEL)
    logits = fused_llama(x, packed['tab'], packed['w_slab'], packed['v_slab'])
    return logits.reshape(B, S, VOCAB)


def init_params(key):
    def w(k, shape, scale=0.05):
        return scale * jax.random.normal(k, shape, dtype=jnp.float32)

    keys = jax.random.split(key, 16)
    GH = GROUPS * HEAD_DIM
    return {
        'emb':      w(keys[0], (VOCAB, D_MODEL), 0.1),
        'norm_w':   jnp.ones((1, D_MODEL), jnp.float32),
        'out_w':    w(keys[1], (D_MODEL, VOCAB)),
        'out_b':    w(keys[2], (1, VOCAB), 0.01),
        'norm1_w':  jnp.ones((NUM_LAYERS, 1, D_MODEL), jnp.float32),
        'norm2_w':  jnp.ones((NUM_LAYERS, 1, D_MODEL), jnp.float32),
        'q_w':      w(keys[3],  (NUM_LAYERS, D_MODEL, D_MODEL)),
        'q_b':      w(keys[4],  (NUM_LAYERS, 1, D_MODEL), 0.01),
        'k_w':      w(keys[5],  (NUM_LAYERS, D_MODEL, GH)),
        'k_b':      w(keys[6],  (NUM_LAYERS, 1, GH), 0.01),
        'v_w':      w(keys[7],  (NUM_LAYERS, D_MODEL, GH)),
        'v_b':      w(keys[8],  (NUM_LAYERS, 1, GH), 0.01),
        'o_w':      w(keys[9],  (NUM_LAYERS, D_MODEL, D_MODEL)),
        'o_b':      w(keys[10], (NUM_LAYERS, 1, D_MODEL), 0.01),
        'ff_in_w':  w(keys[11], (NUM_LAYERS, D_MODEL, 2 * D_FF)),
        'ff_in_b':  w(keys[12], (NUM_LAYERS, 1, 2 * D_FF), 0.01),
        'ff_out_w': w(keys[13], (NUM_LAYERS, D_FF, D_MODEL)),
        'ff_out_b': w(keys[14], (NUM_LAYERS, 1, D_MODEL), 0.01),
    }


# ---------------- pure-JAX reference (same assumed semantics, f32) ----------------

def llama_reference(tokens, p):
    B, S = tokens.shape
    d2 = HEAD_DIM // 2
    x = (p['emb'][tokens] * math.sqrt(D_MODEL))
    theta = 1.0 / (10000.0 ** (jnp.arange(0, HEAD_DIM, 2, dtype=jnp.float32) / HEAD_DIM))
    idx = jnp.arange(B, dtype=jnp.float32)               # batch index (reference behaviour)
    ang = jnp.concatenate([idx[:, None] * theta[None, :]] * 2, axis=1)      # (B, d)
    cos = jnp.cos(ang)[:, None, None, :]
    sin = jnp.sin(ang)[:, None, None, :]

    def rope(t):
        neg = jnp.concatenate([-t[..., d2:], t[..., :d2]], axis=-1)
        return t * cos + neg * sin

    def rmsnorm(h, w):
        ms = jnp.mean(h * h, axis=-1, keepdims=True)
        return h * jax.lax.rsqrt(ms + RMS_EPS) * w

    scale = 1.0 / math.sqrt(HEAD_DIM)
    causal = jnp.tril(jnp.ones((S, S), bool))
    for l in range(NUM_LAYERS):
        h = rmsnorm(x, p['norm1_w'][l][0])
        q = (h @ p['q_w'][l] + p['q_b'][l][0]).reshape(B, S, NHEAD, HEAD_DIM).transpose(0, 2, 1, 3)
        k = (h @ p['k_w'][l] + p['k_b'][l][0]).reshape(B, S, GROUPS, HEAD_DIM).transpose(0, 2, 1, 3)
        v = (h @ p['v_w'][l] + p['v_b'][l][0]).reshape(B, S, GROUPS, HEAD_DIM).transpose(0, 2, 1, 3)
        q, k = rope(q), rope(k)
        k = jnp.repeat(k, HPG, axis=1)
        v = jnp.repeat(v, HPG, axis=1)
        s = jnp.einsum('bhqd,bhkd->bhqk', q, k) * scale
        s = jnp.where(causal[None, None], s, -jnp.inf)
        a = jax.nn.softmax(s, axis=-1)
        o = jnp.einsum('bhqk,bhkd->bhqd', a, v).transpose(0, 2, 1, 3).reshape(B, S, D_MODEL)
        x = x + o @ p['o_w'][l] + p['o_b'][l][0]
        h2 = rmsnorm(x, p['norm2_w'][l][0])
        ff = h2 @ p['ff_in_w'][l] + p['ff_in_b'][l][0]
        u, vg = ff[..., :D_FF], ff[..., D_FF:]
        x = x + (u * (vg * jax.nn.sigmoid(vg))) @ p['ff_out_w'][l] + p['ff_out_b'][l][0]
    x = rmsnorm(x, p['norm_w'][0])
    return x @ p['out_w'] + p['out_b'][0]


if __name__ == "__main__":
    key = jax.random.PRNGKey(0)
    pkey, tkey = jax.random.split(key)
    params = init_params(pkey)
    tokens = jax.random.randint(tkey, (BATCH, SEQ), 0, VOCAB, dtype=jnp.int32)

    packed = pack_params(params)
    fwd = jax.jit(functools.partial(llama_forward, packed=packed))
    logits = fwd(tokens)
    jax.block_until_ready(logits)

    assert logits.shape == (BATCH, SEQ, VOCAB)
    assert bool(jnp.all(jnp.isfinite(logits)))

    # Loose sanity check vs. a pure-f32 JAX reference (kernel uses bf16 MXU operands).
    ref = llama_reference(tokens, params)
    err = float(jnp.max(jnp.abs(logits - ref)))
    assert err < 5e-2, f"kernel vs reference mismatch: max abs err = {err}"

    print("KERNEL_OK")
</pallas_src>

<mosaic_0001>
module attributes {stable_mosaic.version = 11 : i64} {
  func.func @_llama_fwd_kernel(%arg0: i32, %arg1: memref<16x32xf32, #tpu.memory_space<vmem>>, %arg2: memref<16x80xf32, #tpu.memory_space<vmem>>, %arg3: memref<32x1408xbf16, #tpu.memory_space<vmem>>, %arg4: memref<14x256xf32, #tpu.memory_space<vmem>>, %arg5: memref<16x128xf32, #tpu.memory_space<vmem>>) attributes {dimension_semantics = [#tpu.dimension_semantics<arbitrary>], iteration_bounds = array<i64: 1>, scalar_prefetch = 0 : i64, scratch_operands = 0 : i64, tpu.core_type = #tpu.core_type<tc>, window_params = [{pipeline_mode = #tpu.pipeline_mode<synchronous>, transform_indices = @transform_0, window_bounds = array<i64: 16, 32>}, {pipeline_mode = #tpu.pipeline_mode<synchronous>, transform_indices = @transform_1, window_bounds = array<i64: 16, 80>}, {pipeline_mode = #tpu.pipeline_mode<synchronous>, transform_indices = @transform_2, window_bounds = array<i64: 32, 1408>}, {pipeline_mode = #tpu.pipeline_mode<synchronous>, transform_indices = @transform_3, window_bounds = array<i64: 14, 256>}, {pipeline_mode = #tpu.pipeline_mode<synchronous>, transform_indices = @transform_4, window_bounds = array<i64: 16, 128>}]} {
    %c0 = arith.constant 0 : index
    %c0_0 = arith.constant 0 : index
    %0 = vector.load %arg1[%c0, %c0_0] : memref<16x32xf32, #tpu.memory_space<vmem>>, vector<16x32xf32>
    %c0_1 = arith.constant 0 : index
    %c0_2 = arith.constant 0 : index
    %1 = vector.load %arg2[%c0_1, %c0_2] : memref<16x80xf32, #tpu.memory_space<vmem>>, vector<16x32xf32>
    %c0_3 = arith.constant 0 : index
    %c32 = arith.constant 32 : index
    %2 = vector.load %arg2[%c0_3, %c32] : memref<16x80xf32, #tpu.memory_space<vmem>>, vector<16x32xf32>
    %c0_4 = arith.constant 0 : index
    %c64 = arith.constant 64 : index
    %3 = vector.load %arg2[%c0_4, %c64] : memref<16x80xf32, #tpu.memory_space<vmem>>, vector<16x16xf32>
    %4 = vector.extract_strided_slice %1 {offsets = [0, 0], sizes = [16, 16], strides = [1, 1]} : vector<16x32xf32> to vector<16x16xf32>
    %5 = vector.extract_strided_slice %2 {offsets = [0, 0], sizes = [16, 16], strides = [1, 1]} : vector<16x32xf32> to vector<16x16xf32>
    %c0_5 = arith.constant 0 : index
    %c0_6 = arith.constant 0 : index
    %6 = vector.load %arg4[%c0_5, %c0_6] : memref<14x256xf32, #tpu.memory_space<vmem>>, vector<1x32xf32>
    %c1 = arith.constant 1 : index
    %c0_7 = arith.constant 0 : index
    %7 = vector.load %arg4[%c1, %c0_7] : memref<14x256xf32, #tpu.memory_space<vmem>>, vector<1x112xf32>
    %c2 = arith.constant 2 : index
    %c0_8 = arith.constant 0 : index
    %8 = vector.load %arg4[%c2, %c0_8] : memref<14x256xf32, #tpu.memory_space<vmem>>, vector<1x32xf32>
    %c3 = arith.constant 3 : index
    %c0_9 = arith.constant 0 : index
    %9 = vector.load %arg4[%c3, %c0_9] : memref<14x256xf32, #tpu.memory_space<vmem>>, vector<1x32xf32>
    %c4 = arith.constant 4 : index
    %c0_10 = arith.constant 0 : index
    %10 = vector.load %arg4[%c4, %c0_10] : memref<14x256xf32, #tpu.memory_space<vmem>>, vector<1x256xf32>
    %c5 = arith.constant 5 : index
    %c0_11 = arith.constant 0 : index
    %11 = vector.load %arg4[%c5, %c0_11] : memref<14x256xf32, #tpu.memory_space<vmem>>, vector<1x32xf32>
    %c0_12 = arith.constant 0 : index
    %c0_13 = arith.constant 0 : index
    %12 = vector.load %arg3[%c0_12, %c0_13] : memref<32x1408xbf16, #tpu.memory_space<vmem>>, vector<32x112xbf16>
    %c0_14 = arith.constant 0 : index
    %c128 = arith.constant 128 : index
    %13 = vector.load %arg3[%c0_14, %c128] : memref<32x1408xbf16, #tpu.memory_space<vmem>>, vector<32x256xbf16>
    %c0_15 = arith.constant 0 : index
    %c384 = arith.constant 384 : index
    %14 = vector.load %arg3[%c0_15, %c384] : memref<32x1408xbf16, #tpu.memory_space<vmem>>, vector<32x128xbf16>
    %c0_16 = arith.constant 0 : index
    %c512 = arith.constant 512 : index
    %15 = vector.load %arg3[%c0_16, %c512] : memref<32x1408xbf16, #tpu.memory_space<vmem>>, vector<32x32xbf16>
    %16 = arith.mulf %0, %0 : vector<16x32xf32>
    %cst = arith.constant dense<0.000000e+00> : vector<16xf32>
    %17 = vector.multi_reduction <add>, %16, %cst [1] : vector<16x32xf32> to vector<16xf32>
    %18 = vector.shape_cast %17 : vector<16xf32> to vector<16x1xf32>
    %cst_17 = arith.constant 3.200000e+01 : f32
    %19 = vector.broadcast %cst_17 : f32 to vector<16x1xf32>
    %20 = arith.divf %18, %19 : vector<16x1xf32>
    %cst_18 = arith.constant 1.1920929E-7 : f32
    %21 = vector.broadcast %cst_18 : f32 to vector<16x1xf32>
    %22 = arith.addf %20, %21 : vector<16x1xf32>
    %23 = math.rsqrt %22 : vector<16x1xf32>
    %24 = vector.broadcast %23 : vector<16x1xf32> to vector<16x32xf32>
    %25 = arith.mulf %0, %24 : vector<16x32xf32>
    %26 = vector.broadcast %6 : vector<1x32xf32> to vector<16x32xf32>
    %27 = arith.mulf %25, %26 : vector<16x32xf32>
    %28 = arith.truncf %27 : vector<16x32xf32> to vector<16x32xbf16>
    %cst_19 = arith.constant dense<0.000000e+00> : vector<16x112xf32>
    %29 = tpu.matmul %28, %12, %cst_19 {dimension_numbers = #tpu.dot_dimension_numbers<[1], [0], [0], [1], [0, 0, 1, 1], [], []>} : vector<16x32xbf16>, vector<32x112xbf16>, vector<16x112xf32> -> vector<16x112xf32>
    %30 = vector.broadcast %7 : vector<1x112xf32> to vector<16x112xf32>
    %31 = arith.addf %29, %30 : vector<16x112xf32>
    %32 = vector.extract_strided_slice %31 {offsets = [0, 0], sizes = [16, 32], strides = [1, 1]} : vector<16x112xf32> to vector<16x32xf32>
    %33 = vector.extract_strided_slice %31 {offsets = [0, 32], sizes = [16, 16], strides = [1, 1]} : vector<16x112xf32> to vector<16x16xf32>
    %34 = vector.extract_strided_slice %31 {offsets = [0, 48], sizes = [16, 16], strides = [1, 1]} : vector<16x112xf32> to vector<16x16xf32>
    %35 = vector.extract_strided_slice %31 {offsets = [0, 64], sizes = [16, 32], strides = [1, 1]} : vector<16x112xf32> to vector<16x32xf32>
    %36 = vector.extract_strided_slice %31 {offsets = [0, 96], sizes = [16, 16], strides = [1, 1]} : vector<16x112xf32> to vector<16x16xf32>
    %37 = arith.mulf %32, %1 : vector<16x32xf32>
    %38 = arith.mulf %35, %2 : vector<16x32xf32>
    %39 = arith.addf %37, %38 : vector<16x32xf32>
    %40 = arith.truncf %39 : vector<16x32xf32> to vector<16x32xbf16>
    %41 = arith.mulf %33, %4 : vector<16x16xf32>
    %42 = arith.mulf %36, %5 : vector<16x16xf32>
    %43 = arith.addf %41, %42 : vector<16x16xf32>
    %44 = arith.truncf %43 : vector<16x16xf32> to vector<16x16xbf16>
    %45 = arith.truncf %34 : vector<16x16xf32> to vector<16x16xbf16>
    %46 = vector.extract_strided_slice %40 {offsets = [0, 0], sizes = [16, 8], strides = [1, 1]} : vector<16x32xbf16> to vector<16x8xbf16>
    %47 = vector.extract_strided_slice %44 {offsets = [0, 0], sizes = [16, 8], strides = [1, 1]} : vector<16x16xbf16> to vector<16x8xbf16>
    %48 = vector.extract_strided_slice %45 {offsets = [0, 0], sizes = [16, 8], strides = [1, 1]} : vector<16x16xbf16> to vector<16x8xbf16>
    %cst_20 = arith.constant dense<0.000000e+00> : vector<16x16xf32>
    %49 = tpu.matmul %46, %47, %cst_20 {dimension_numbers = #tpu.dot_dimension_numbers<[1], [1], [0], [0], [0, 0, 1, 0], [], []>} : vector<16x8xbf16>, vector<16x8xbf16>, vector<16x16xf32> -> vector<16x16xf32>
    %50 = arith.addf %49, %3 : vector<16x16xf32>
    %cst_21 = arith.constant dense<0xFF800000> : vector<16xf32>
    %51 = vector.multi_reduction <maximumf>, %50, %cst_21 [1] : vector<16x16xf32> to vector<16xf32>
    %52 = vector.shape_cast %51 : vector<16xf32> to vector<16x1xf32>
    %53 = vector.broadcast %52 : vector<16x1xf32> to vector<16x16xf32>
    %54 = arith.subf %50, %53 : vector<16x16xf32>
    %55 = math.exp %54 : vector<16x16xf32>
    %cst_22 = arith.constant dense<0.000000e+00> : vector<16xf32>
    %56 = vector.multi_reduction <add>, %55, %cst_22 [1] : vector<16x16xf32> to vector<16xf32>
    %57 = vector.shape_cast %56 : vector<16xf32> to vector<16x1xf32>
    %58 = tpu.reciprocal %57 : vector<16x1xf32> -> vector<16x1xf32>
    %59 = vector.broadcast %58 : vector<16x1xf32> to vector<16x16xf32>
    %60 = arith.mulf %55, %59 : vector<16x16xf32>
    %61 = arith.truncf %60 : vector<16x16xf32> to vector<16x16xbf16>
    %cst_23 = arith.constant dense<0.000000e+00> : vector<16x8xf32>
    %62 = tpu.matmul %61, %48, %cst_23 {dimension_numbers = #tpu.dot_dimension_numbers<[1], [0], [0], [1], [0, 0, 1, 1], [], []>} : vector<16x16xbf16>, vector<16x8xbf16>, vector<16x8xf32> -> vector<16x8xf32>
    %63 = vector.extract_strided_slice %40 {offsets = [0, 8], sizes = [16, 8], strides = [1, 1]} : vector<16x32xbf16> to vector<16x8xbf16>
    %64 = vector.extract_strided_slice %44 {offsets = [0, 0], sizes = [16, 8], strides = [1, 1]} : vector<16x16xbf16> to vector<16x8xbf16>
    %65 = vector.extract_strided_slice %45 {offsets = [0, 0], sizes = [16, 8], strides = [1, 1]} : vector<16x16xbf16> to vector<16x8xbf16>
    %cst_24 = arith.constant dense<0.000000e+00> : vector<16x16xf32>
    %66 = tpu.matmul %63, %64, %cst_24 {dimension_numbers = #tpu.dot_dimension_numbers<[1], [1], [0], [0], [0, 0, 1, 0], [], []>} : vector<16x8xbf16>, vector<16x8xbf16>, vector<16x16xf32> -> vector<16x16xf32>
    %67 = arith.addf %66, %3 : vector<16x16xf32>
    %cst_25 = arith.constant dense<0xFF800000> : vector<16xf32>
    %68 = vector.multi_reduction <maximumf>, %67, %cst_25 [1] : vector<16x16xf32> to vector<16xf32>
    %69 = vector.shape_cast %68 : vector<16xf32> to vector<16x1xf32>
    %70 = vector.broadcast %69 : vector<16x1xf32> to vector<16x16xf32>
    %71 = arith.subf %67, %70 : vector<16x16xf32>
    %72 = math.exp %71 : vector<16x16xf32>
    %cst_26 = arith.constant dense<0.000000e+00> : vector<16xf32>
    %73 = vector.multi_reduction <add>, %72, %cst_26 [1] : vector<16x16xf32> to vector<16xf32>
    %74 = vector.shape_cast %73 : vector<16xf32> to vector<16x1xf32>
    %75 = tpu.reciprocal %74 : vector<16x1xf32> -> vector<16x1xf32>
    %76 = vector.broadcast %75 : vector<16x1xf32> to vector<16x16xf32>
    %77 = arith.mulf %72, %76 : vector<16x16xf32>
    %78 = arith.truncf %77 : vector<16x16xf32> to vector<16x16xbf16>
    %cst_27 = arith.constant dense<0.000000e+00> : vector<16x8xf32>
    %79 = tpu.matmul %78, %65, %cst_27 {dimension_numbers = #tpu.dot_dimension_numbers<[1], [0], [0], [1], [0, 0, 1, 1], [], []>} : vector<16x16xbf16>, vector<16x8xbf16>, vector<16x8xf32> -> vector<16x8xf32>
    %80 = vector.extract_strided_slice %40 {offsets = [0, 16], sizes = [16, 8], strides = [1, 1]} : vector<16x32xbf16> to vector<16x8xbf16>
    %81 = vector.extract_strided_slice %44 {offsets = [0, 8], sizes = [16, 8], strides = [1, 1]} : vector<16x16xbf16> to vector<16x8xbf16>
    %82 = vector.extract_strided_slice %45 {offsets = [0, 8], sizes = [16, 8], strides = [1, 1]} : vector<16x16xbf16> to vector<16x8xbf16>
    %cst_28 = arith.constant dense<0.000000e+00> : vector<16x16xf32>
    %83 = tpu.matmul %80, %81, %cst_28 {dimension_numbers = #tpu.dot_dimension_numbers<[1], [1], [0], [0], [0, 0, 1, 0], [], []>} : vector<16x8xbf16>, vector<16x8xbf16>, vector<16x16xf32> -> vector<16x16xf32>
    %84 = arith.addf %83, %3 : vector<16x16xf32>
    %cst_29 = arith.constant dense<0xFF800000> : vector<16xf32>
    %85 = vector.multi_reduction <maximumf>, %84, %cst_29 [1] : vector<16x16xf32> to vector<16xf32>
    %86 = vector.shape_cast %85 : vector<16xf32> to vector<16x1xf32>
    %87 = vector.broadcast %86 : vector<16x1xf32> to vector<16x16xf32>
    %88 = arith.subf %84, %87 : vector<16x16xf32>
    %89 = math.exp %88 : vector<16x16xf32>
    %cst_30 = arith.constant dense<0.000000e+00> : vector<16xf32>
    %90 = vector.multi_reduction <add>, %89, %cst_30 [1] : vector<16x16xf32> to vector<16xf32>
    %91 = vector.shape_cast %90 : vector<16xf32> to vector<16x1xf32>
    %92 = tpu.reciprocal %91 : vector<16x1xf32> -> vector<16x1xf32>
    %93 = vector.broadcast %92 : vector<16x1xf32> to vector<16x16xf32>
    %94 = arith.mulf %89, %93 : vector<16x16xf32>
    %95 = arith.truncf %94 : vector<16x16xf32> to vector<16x16xbf16>
    %cst_31 = arith.constant dense<0.000000e+00> : vector<16x8xf32>
    %96 = tpu.matmul %95, %82, %cst_31 {dimension_numbers = #tpu.dot_dimension_numbers<[1], [0], [0], [1], [0, 0, 1, 1], [], []>} : vector<16x16xbf16>, vector<16x8xbf16>, vector<16x8xf32> -> vector<16x8xf32>
    %97 = vector.extract_strided_slice %40 {offsets = [0, 24], sizes = [16, 8], strides = [1, 1]} : vector<16x32xbf16> to vector<16x8xbf16>
    %98 = vector.extract_strided_slice %44 {offsets = [0, 8], sizes = [16, 8], strides = [1, 1]} : vector<16x16xbf16> to vector<16x8xbf16>
    %99 = vector.extract_strided_slice %45 {offsets = [0, 8], sizes = [16, 8], strides = [1, 1]} : vector<16x16xbf16> to vector<16x8xbf16>
    %cst_32 = arith.constant dense<0.000000e+00> : vector<16x16xf32>
    %100 = tpu.matmul %97, %98, %cst_32 {dimension_numbers = #tpu.dot_dimension_numbers<[1], [1], [0], [0], [0, 0, 1, 0], [], []>} : vector<16x8xbf16>, vector<16x8xbf16>, vector<16x16xf32> -> vector<16x16xf32>
    %101 = arith.addf %100, %3 : vector<16x16xf32>
    %cst_33 = arith.constant dense<0xFF800000> : vector<16xf32>
    %102 = vector.multi_reduction <maximumf>, %101, %cst_33 [1] : vector<16x16xf32> to vector<16xf32>
    %103 = vector.shape_cast %102 : vector<16xf32> to vector<16x1xf32>
    %104 = vector.broadcast %103 : vector<16x1xf32> to vector<16x16xf32>
    %105 = arith.subf %101, %104 : vector<16x16xf32>
    %106 = math.exp %105 : vector<16x16xf32>
    %cst_34 = arith.constant dense<0.000000e+00> : vector<16xf32>
    %107 = vector.multi_reduction <add>, %106, %cst_34 [1] : vector<16x16xf32> to vector<16xf32>
    %108 = vector.shape_cast %107 : vector<16xf32> to vector<16x1xf32>
    %109 = tpu.reciprocal %108 : vector<16x1xf32> -> vector<16x1xf32>
    %110 = vector.broadcast %109 : vector<16x1xf32> to vector<16x16xf32>
    %111 = arith.mulf %106, %110 : vector<16x16xf32>
    %112 = arith.truncf %111 : vector<16x16xf32> to vector<16x16xbf16>
    %cst_35 = arith.constant dense<0.000000e+00> : vector<16x8xf32>
    %113 = tpu.matmul %112, %99, %cst_35 {dimension_numbers = #tpu.dot_dimension_numbers<[1], [0], [0], [1], [0, 0, 1, 1], [], []>} : vector<16x16xbf16>, vector<16x8xbf16>, vector<16x8xf32> -> vector<16x8xf32>
    %114 = tpu.concatenate %62, %79, %96, %113 in 1 : vector<16x8xf32>, vector<16x8xf32>, vector<16x8xf32>, vector<16x8xf32> -> vector<16x32xf32>
    %115 = arith.truncf %114 : vector<16x32xf32> to vector<16x32xbf16>
    %cst_36 = arith.constant dense<0.000000e+00> : vector<16x32xf32>
    %116 = tpu.matmul %115, %15, %cst_36 {dimension_numbers = #tpu.dot_dimension_numbers<[1], [0], [0], [1], [0, 0, 1, 1], [], []>} : vector<16x32xbf16>, vector<32x32xbf16>, vector<16x32xf32> -> vector<16x32xf32>
    %117 = vector.broadcast %8 : vector<1x32xf32> to vector<16x32xf32>
    %118 = arith.addf %116, %117 : vector<16x32xf32>
    %119 = arith.addf %0, %118 : vector<16x32xf32>
    %120 = arith.mulf %119, %119 : vector<16x32xf32>
    %cst_37 = arith.constant dense<0.000000e+00> : vector<16xf32>
    %121 = vector.multi_reduction <add>, %120, %cst_37 [1] : vector<16x32xf32> to vector<16xf32>
    %122 = vector.shape_cast %121 : vector<16xf32> to vector<16x1xf32>
    %cst_38 = arith.constant 3.200000e+01 : f32
    %123 = vector.broadcast %cst_38 : f32 to vector<16x1xf32>
    %124 = arith.divf %122, %123 : vector<16x1xf32>
    %cst_39 = arith.constant 1.1920929E-7 : f32
    %125 = vector.broadcast %cst_39 : f32 to vector<16x1xf32>
    %126 = arith.addf %124, %125 : vector<16x1xf32>
    %127 = math.rsqrt %126 : vector<16x1xf32>
    %128 = vector.broadcast %127 : vector<16x1xf32> to vector<16x32xf32>
    %129 = arith.mulf %119, %128 : vector<16x32xf32>
    %130 = vector.broadcast %9 : vector<1x32xf32> to vector<16x32xf32>
    %131 = arith.mulf %129, %130 : vector<16x32xf32>
    %132 = arith.truncf %131 : vector<16x32xf32> to vector<16x32xbf16>
    %cst_40 = arith.constant dense<0.000000e+00> : vector<16x256xf32>
    %133 = tpu.matmul %132, %13, %cst_40 {dimension_numbers = #tpu.dot_dimension_numbers<[1], [0], [0], [1], [0, 0, 1, 1], [], []>} : vector<16x32xbf16>, vector<32x256xbf16>, vector<16x256xf32> -> vector<16x256xf32>
    %134 = vector.broadcast %10 : vector<1x256xf32> to vector<16x256xf32>
    %135 = arith.addf %133, %134 : vector<16x256xf32>
    %136 = vector.extract_strided_slice %135 {offsets = [0, 0], sizes = [16, 128], strides = [1, 1]} : vector<16x256xf32> to vector<16x128xf32>
    %137 = vector.extract_strided_slice %135 {offsets = [0, 128], sizes = [16, 128], strides = [1, 1]} : vector<16x256xf32> to vector<16x128xf32>
    %138 = arith.negf %137 : vector<16x128xf32>
    %139 = math.exp %138 : vector<16x128xf32>
    %cst_41 = arith.constant 1.000000e+00 : f32
    %140 = vector.broadcast %cst_41 : f32 to vector<16x128xf32>
    %141 = arith.addf %140, %139 : vector<16x128xf32>
    %142 = arith.divf %140, %141 : vector<16x128xf32>
    %143 = arith.mulf %137, %142 : vector<16x128xf32>
    %144 = arith.mulf %136, %143 : vector<16x128xf32>
    %145 = arith.truncf %144 : vector<16x128xf32> to vector<16x128xbf16>
    %cst_42 = arith.constant dense<0.000000e+00> : vector<16x32xf32>
    %146 = tpu.matmul %145, %14, %cst_42 {dimension_numbers = #tpu.dot_dimension_numbers<[1], [1], [0], [0], [0, 0, 1, 0], [], []>} : vector<16x128xbf16>, vector<32x128xbf16>, vector<16x32xf32> -> vector<16x32xf32>
    %147 = vector.broadcast %11 : vector<1x32xf32> to vector<16x32xf32>
    %148 = arith.addf %146, %147 : vector<16x32xf32>
    %149 = arith.addf %119, %148 : vector<16x32xf32>
    %c6 = arith.constant 6 : index
    %c0_43 = arith.constant 0 : index
    %150 = vector.load %arg4[%c6, %c0_43] : memref<14x256xf32, #tpu.memory_space<vmem>>, vector<1x32xf32>
    %c7 = arith.constant 7 : index
    %c0_44 = arith.constant 0 : index
    %151 = vector.load %arg4[%c7, %c0_44] : memref<14x256xf32, #tpu.memory_space<vmem>>, vector<1x112xf32>
    %c8 = arith.constant 8 : index
    %c0_45 = arith.constant 0 : index
    %152 = vector.load %arg4[%c8, %c0_45] : memref<14x256xf32, #tpu.memory_space<vmem>>, vector<1x32xf32>
    %c9 = arith.constant 9 : index
    %c0_46 = arith.constant 0 : index
    %153 = vector.load %arg4[%c9, %c0_46] : memref<14x256xf32, #tpu.memory_space<vmem>>, vector<1x32xf32>
    %c10 = arith.constant 10 : index
    %c0_47 = arith.constant 0 : index
    %154 = vector.load %arg4[%c10, %c0_47] : memref<14x256xf32, #tpu.memory_space<vmem>>, vector<1x256xf32>
    %c11 = arith.constant 11 : index
    %c0_48 = arith.constant 0 : index
    %155 = vector.load %arg4[%c11, %c0_48] : memref<14x256xf32, #tpu.memory_space<vmem>>, vector<1x32xf32>
    %c0_49 = arith.constant 0 : index
    %c640 = arith.constant 640 : index
    %156 = vector.load %arg3[%c0_49, %c640] : memref<32x1408xbf16, #tpu.memory_space<vmem>>, vector<32x112xbf16>
    %c0_50 = arith.constant 0 : index
    %c768 = arith.constant 768 : index
    %157 = vector.load %arg3[%c0_50, %c768] : memref<32x1408xbf16, #tpu.memory_space<vmem>>, vector<32x256xbf16>
    %c0_51 = arith.constant 0 : index
    %c1024 = arith.constant 1024 : index
    %158 = vector.load %arg3[%c0_51, %c1024] : memref<32x1408xbf16, #tpu.memory_space<vmem>>, vector<32x128xbf16>
    %c0_52 = arith.constant 0 : index
    %c1152 = arith.constant 1152 : index
    %159 = vector.load %arg3[%c0_52, %c1152] : memref<32x1408xbf16, #tpu.memory_space<vmem>>, vector<32x32xbf16>
    %160 = arith.mulf %149, %149 : vector<16x32xf32>
    %cst_53 = arith.constant dense<0.000000e+00> : vector<16xf32>
    %161 = vector.multi_reduction <add>, %160, %cst_53 [1] : vector<16x32xf32> to vector<16xf32>
    %162 = vector.shape_cast %161 : vector<16xf32> to vector<16x1xf32>
    %cst_54 = arith.constant 3.200000e+01 : f32
    %163 = vector.broadcast %cst_54 : f32 to vector<16x1xf32>
    %164 = arith.divf %162, %163 : vector<16x1xf32>
    %cst_55 = arith.constant 1.1920929E-7 : f32
    %165 = vector.broadcast %cst_55 : f32 to vector<16x1xf32>
    %166 = arith.addf %164, %165 : vector<16x1xf32>
    %167 = math.rsqrt %166 : vector<16x1xf32>
    %168 = vector.broadcast %167 : vector<16x1xf32> to vector<16x32xf32>
    %169 = arith.mulf %149, %168 : vector<16x32xf32>
    %170 = vector.broadcast %150 : vector<1x32xf32> to vector<16x32xf32>
    %171 = arith.mulf %169, %170 : vector<16x32xf32>
    %172 = arith.truncf %171 : vector<16x32xf32> to vector<16x32xbf16>
    %cst_56 = arith.constant dense<0.000000e+00> : vector<16x112xf32>
    %173 = tpu.matmul %172, %156, %cst_56 {dimension_numbers = #tpu.dot_dimension_numbers<[1], [0], [0], [1], [0, 0, 1, 1], [], []>} : vector<16x32xbf16>, vector<32x112xbf16>, vector<16x112xf32> -> vector<16x112xf32>
    %174 = vector.broadcast %151 : vector<1x112xf32> to vector<16x112xf32>
    %175 = arith.addf %173, %174 : vector<16x112xf32>
    %176 = vector.extract_strided_slice %175 {offsets = [0, 0], sizes = [16, 32], strides = [1, 1]} : vector<16x112xf32> to vector<16x32xf32>
    %177 = vector.extract_strided_slice %175 {offsets = [0, 32], sizes = [16, 16], strides = [1, 1]} : vector<16x112xf32> to vector<16x16xf32>
    %178 = vector.extract_strided_slice %175 {offsets = [0, 48], sizes = [16, 16], strides = [1, 1]} : vector<16x112xf32> to vector<16x16xf32>
    %179 = vector.extract_strided_slice %175 {offsets = [0, 64], sizes = [16, 32], strides = [1, 1]} : vector<16x112xf32> to vector<16x32xf32>
    %180 = vector.extract_strided_slice %175 {offsets = [0, 96], sizes = [16, 16], strides = [1, 1]} : vector<16x112xf32> to vector<16x16xf32>
    %181 = arith.mulf %176, %1 : vector<16x32xf32>
    %182 = arith.mulf %179, %2 : vector<16x32xf32>
    %183 = arith.addf %181, %182 : vector<16x32xf32>
    %184 = arith.truncf %183 : vector<16x32xf32> to vector<16x32xbf16>
    %185 = arith.mulf %177, %4 : vector<16x16xf32>
    %186 = arith.mulf %180, %5 : vector<16x16xf32>
    %187 = arith.addf %185, %186 : vector<16x16xf32>
    %188 = arith.truncf %187 : vector<16x16xf32> to vector<16x16xbf16>
    %189 = arith.truncf %178 : vector<16x16xf32> to vector<16x16xbf16>
    %190 = vector.extract_strided_slice %184 {offsets = [0, 0], sizes = [16, 8], strides = [1, 1]} : vector<16x32xbf16> to vector<16x8xbf16>
    %191 = vector.extract_strided_slice %188 {offsets = [0, 0], sizes = [16, 8], strides = [1, 1]} : vector<16x16xbf16> to vector<16x8xbf16>
    %192 = vector.extract_strided_slice %189 {offsets = [0, 0], sizes = [16, 8], strides = [1, 1]} : vector<16x16xbf16> to vector<16x8xbf16>
    %cst_57 = arith.constant dense<0.000000e+00> : vector<16x16xf32>
    %193 = tpu.matmul %190, %191, %cst_57 {dimension_numbers = #tpu.dot_dimension_numbers<[1], [1], [0], [0], [0, 0, 1, 0], [], []>} : vector<16x8xbf16>, vector<16x8xbf16>, vector<16x16xf32> -> vector<16x16xf32>
    %194 = arith.addf %193, %3 : vector<16x16xf32>
    %cst_58 = arith.constant dense<0xFF800000> : vector<16xf32>
    %195 = vector.multi_reduction <maximumf>, %194, %cst_58 [1] : vector<16x16xf32> to vector<16xf32>
    %196 = vector.shape_cast %195 : vector<16xf32> to vector<16x1xf32>
    %197 = vector.broadcast %196 : vector<16x1xf32> to vector<16x16xf32>
    %198 = arith.subf %194, %197 : vector<16x16xf32>
    %199 = math.exp %198 : vector<16x16xf32>
    %cst_59 = arith.constant dense<0.000000e+00> : vector<16xf32>
    %200 = vector.multi_reduction <add>, %199, %cst_59 [1] : vector<16x16xf32> to vector<16xf32>
    %201 = vector.shape_cast %200 : vector<16xf32> to vector<16x1xf32>
    %202 = tpu.reciprocal %201 : vector<16x1xf32> -> vector<16x1xf32>
    %203 = vector.broadcast %202 : vector<16x1xf32> to vector<16x16xf32>
    %204 = arith.mulf %199, %203 : vector<16x16xf32>
    %205 = arith.truncf %204 : vector<16x16xf32> to vector<16x16xbf16>
    %cst_60 = arith.constant dense<0.000000e+00> : vector<16x8xf32>
    %206 = tpu.matmul %205, %192, %cst_60 {dimension_numbers = #tpu.dot_dimension_numbers<[1], [0], [0], [1], [0, 0, 1, 1], [], []>} : vector<16x16xbf16>, vector<16x8xbf16>, vector<16x8xf32> -> vector<16x8xf32>
    %207 = vector.extract_strided_slice %184 {offsets = [0, 8], sizes = [16, 8], strides = [1, 1]} : vector<16x32xbf16> to vector<16x8xbf16>
    %208 = vector.extract_strided_slice %188 {offsets = [0, 0], sizes = [16, 8], strides = [1, 1]} : vector<16x16xbf16> to vector<16x8xbf16>
    %209 = vector.extract_strided_slice %189 {offsets = [0, 0], sizes = [16, 8], strides = [1, 1]} : vector<16x16xbf16> to vector<16x8xbf16>
    %cst_61 = arith.constant dense<0.000000e+00> : vector<16x16xf32>
    %210 = tpu.matmul %207, %208, %cst_61 {dimension_numbers = #tpu.dot_dimension_numbers<[1], [1], [0], [0], [0, 0, 1, 0], [], []>} : vector<16x8xbf16>, vector<16x8xbf16>, vector<16x16xf32> -> vector<16x16xf32>
    %211 = arith.addf %210, %3 : vector<16x16xf32>
    %cst_62 = arith.constant dense<0xFF800000> : vector<16xf32>
    %212 = vector.multi_reduction <maximumf>, %211, %cst_62 [1] : vector<16x16xf32> to vector<16xf32>
    %213 = vector.shape_cast %212 : vector<16xf32> to vector<16x1xf32>
    %214 = vector.broadcast %213 : vector<16x1xf32> to vector<16x16xf32>
    %215 = arith.subf %211, %214 : vector<16x16xf32>
    %216 = math.exp %215 : vector<16x16xf32>
    %cst_63 = arith.constant dense<0.000000e+00> : vector<16xf32>
    %217 = vector.multi_reduction <add>, %216, %cst_63 [1] : vector<16x16xf32> to vector<16xf32>
    %218 = vector.shape_cast %217 : vector<16xf32> to vector<16x1xf32>
    %219 = tpu.reciprocal %218 : vector<16x1xf32> -> vector<16x1xf32>
    %220 = vector.broadcast %219 : vector<16x1xf32> to vector<16x16xf32>
    %221 = arith.mulf %216, %220 : vector<16x16xf32>
    %222 = arith.truncf %221 : vector<16x16xf32> to vector<16x16xbf16>
    %cst_64 = arith.constant dense<0.000000e+00> : vector<16x8xf32>
    %223 = tpu.matmul %222, %209, %cst_64 {dimension_numbers = #tpu.dot_dimension_numbers<[1], [0], [0], [1], [0, 0, 1, 1], [], []>} : vector<16x16xbf16>, vector<16x8xbf16>, vector<16x8xf32> -> vector<16x8xf32>
    %224 = vector.extract_strided_slice %184 {offsets = [0, 16], sizes = [16, 8], strides = [1, 1]} : vector<16x32xbf16> to vector<16x8xbf16>
    %225 = vector.extract_strided_slice %188 {offsets = [0, 8], sizes = [16, 8], strides = [1, 1]} : vector<16x16xbf16> to vector<16x8xbf16>
    %226 = vector.extract_strided_slice %189 {offsets = [0, 8], sizes = [16, 8], strides = [1, 1]} : vector<16x16xbf16> to vector<16x8xbf16>
    %cst_65 = arith.constant dense<0.000000e+00> : vector<16x16xf32>
    %227 = tpu.matmul %224, %225, %cst_65 {dimension_numbers = #tpu.dot_dimension_numbers<[1], [1], [0], [0], [0, 0, 1, 0], [], []>} : vector<16x8xbf16>, vector<16x8xbf16>, vector<16x16xf32> -> vector<16x16xf32>
    %228 = arith.addf %227, %3 : vector<16x16xf32>
    %cst_66 = arith.constant dense<0xFF800000> : vector<16xf32>
    %229 = vector.multi_reduction <maximumf>, %228, %cst_66 [1] : vector<16x16xf32> to vector<16xf32>
    %230 = vector.shape_cast %229 : vector<16xf32> to vector<16x1xf32>
    %231 = vector.broadcast %230 : vector<16x1xf32> to vector<16x16xf32>
    %232 = arith.subf %228, %231 : vector<16x16xf32>
    %233 = math.exp %232 : vector<16x16xf32>
    %cst_67 = arith.constant dense<0.000000e+00> : vector<16xf32>
    %234 = vector.multi_reduction <add>, %233, %cst_67 [1] : vector<16x16xf32> to vector<16xf32>
    %235 = vector.shape_cast %234 : vector<16xf32> to vector<16x1xf32>
    %236 = tpu.reciprocal %235 : vector<16x1xf32> -> vector<16x1xf32>
    %237 = vector.broadcast %236 : vector<16x1xf32> to vector<16x16xf32>
    %238 = arith.mulf %233, %237 : vector<16x16xf32>
    %239 = arith.truncf %238 : vector<16x16xf32> to vector<16x16xbf16>
    %cst_68 = arith.constant dense<0.000000e+00> : vector<16x8xf32>
    %240 = tpu.matmul %239, %226, %cst_68 {dimension_numbers = #tpu.dot_dimension_numbers<[1], [0], [0], [1], [0, 0, 1, 1], [], []>} : vector<16x16xbf16>, vector<16x8xbf16>, vector<16x8xf32> -> vector<16x8xf32>
    %241 = vector.extract_strided_slice %184 {offsets = [0, 24], sizes = [16, 8], strides = [1, 1]} : vector<16x32xbf16> to vector<16x8xbf16>
    %242 = vector.extract_strided_slice %188 {offsets = [0, 8], sizes = [16, 8], strides = [1, 1]} : vector<16x16xbf16> to vector<16x8xbf16>
    %243 = vector.extract_strided_slice %189 {offsets = [0, 8], sizes = [16, 8], strides = [1, 1]} : vector<16x16xbf16> to vector<16x8xbf16>
    %cst_69 = arith.constant dense<0.000000e+00> : vector<16x16xf32>
    %244 = tpu.matmul %241, %242, %cst_69 {dimension_numbers = #tpu.dot_dimension_numbers<[1], [1], [0], [0], [0, 0, 1, 0], [], []>} : vector<16x8xbf16>, vector<16x8xbf16>, vector<16x16xf32> -> vector<16x16xf32>
    %245 = arith.addf %244, %3 : vector<16x16xf32>
    %cst_70 = arith.constant dense<0xFF800000> : vector<16xf32>
    %246 = vector.multi_reduction <maximumf>, %245, %cst_70 [1] : vector<16x16xf32> to vector<16xf32>
    %247 = vector.shape_cast %246 : vector<16xf32> to vector<16x1xf32>
    %248 = vector.broadcast %247 : vector<16x1xf32> to vector<16x16xf32>
    %249 = arith.subf %245, %248 : vector<16x16xf32>
    %250 = math.exp %249 : vector<16x16xf32>
    %cst_71 = arith.constant dense<0.000000e+00> : vector<16xf32>
    %251 = vector.multi_reduction <add>, %250, %cst_71 [1] : vector<16x16xf32> to vector<16xf32>
    %252 = vector.shape_cast %251 : vector<16xf32> to vector<16x1xf32>
    %253 = tpu.reciprocal %252 : vector<16x1xf32> -> vector<16x1xf32>
    %254 = vector.broadcast %253 : vector<16x1xf32> to vector<16x16xf32>
    %255 = arith.mulf %250, %254 : vector<16x16xf32>
    %256 = arith.truncf %255 : vector<16x16xf32> to vector<16x16xbf16>
    %cst_72 = arith.constant dense<0.000000e+00> : vector<16x8xf32>
    %257 = tpu.matmul %256, %243, %cst_72 {dimension_numbers = #tpu.dot_dimension_numbers<[1], [0], [0], [1], [0, 0, 1, 1], [], []>} : vector<16x16xbf16>, vector<16x8xbf16>, vector<16x8xf32> -> vector<16x8xf32>
    %258 = tpu.concatenate %206, %223, %240, %257 in 1 : vector<16x8xf32>, vector<16x8xf32>, vector<16x8xf32>, vector<16x8xf32> -> vector<16x32xf32>
    %259 = arith.truncf %258 : vector<16x32xf32> to vector<16x32xbf16>
    %cst_73 = arith.constant dense<0.000000e+00> : vector<16x32xf32>
    %260 = tpu.matmul %259, %159, %cst_73 {dimension_numbers = #tpu.dot_dimension_numbers<[1], [0], [0], [1], [0, 0, 1, 1], [], []>} : vector<16x32xbf16>, vector<32x32xbf16>, vector<16x32xf32> -> vector<16x32xf32>
    %261 = vector.broadcast %152 : vector<1x32xf32> to vector<16x32xf32>
    %262 = arith.addf %260, %261 : vector<16x32xf32>
    %263 = arith.addf %149, %262 : vector<16x32xf32>
    %264 = arith.mulf %263, %263 : vector<16x32xf32>
    %cst_74 = arith.constant dense<0.000000e+00> : vector<16xf32>
    %265 = vector.multi_reduction <add>, %264, %cst_74 [1] : vector<16x32xf32> to vector<16xf32>
    %266 = vector.shape_cast %265 : vector<16xf32> to vector<16x1xf32>
    %cst_75 = arith.constant 3.200000e+01 : f32
    %267 = vector.broadcast %cst_75 : f32 to vector<16x1xf32>
    %268 = arith.divf %266, %267 : vector<16x1xf32>
    %cst_76 = arith.constant 1.1920929E-7 : f32
    %269 = vector.broadcast %cst_76 : f32 to vector<16x1xf32>
    %270 = arith.addf %268, %269 : vector<16x1xf32>
    %271 = math.rsqrt %270 : vector<16x1xf32>
    %272 = vector.broadcast %271 : vector<16x1xf32> to vector<16x32xf32>
    %273 = arith.mulf %263, %272 : vector<16x32xf32>
    %274 = vector.broadcast %153 : vector<1x32xf32> to vector<16x32xf32>
    %275 = arith.mulf %273, %274 : vector<16x32xf32>
    %276 = arith.truncf %275 : vector<16x32xf32> to vector<16x32xbf16>
    %cst_77 = arith.constant dense<0.000000e+00> : vector<16x256xf32>
    %277 = tpu.matmul %276, %157, %cst_77 {dimension_numbers = #tpu.dot_dimension_numbers<[1], [0], [0], [1], [0, 0, 1, 1], [], []>} : vector<16x32xbf16>, vector<32x256xbf16>, vector<16x256xf32> -> vector<16x256xf32>
    %278 = vector.broadcast %154 : vector<1x256xf32> to vector<16x256xf32>
    %279 = arith.addf %277, %278 : vector<16x256xf32>
    %280 = vector.extract_strided_slice %279 {offsets = [0, 0], sizes = [16, 128], strides = [1, 1]} : vector<16x256xf32> to vector<16x128xf32>
    %281 = vector.extract_strided_slice %279 {offsets = [0, 128], sizes = [16, 128], strides = [1, 1]} : vector<16x256xf32> to vector<16x128xf32>
    %282 = arith.negf %281 : vector<16x128xf32>
    %283 = math.exp %282 : vector<16x128xf32>
    %cst_78 = arith.constant 1.000000e+00 : f32
    %284 = vector.broadcast %cst_78 : f32 to vector<16x128xf32>
    %285 = arith.addf %284, %283 : vector<16x128xf32>
    %286 = arith.divf %284, %285 : vector<16x128xf32>
    %287 = arith.mulf %281, %286 : vector<16x128xf32>
    %288 = arith.mulf %280, %287 : vector<16x128xf32>
    %289 = arith.truncf %288 : vector<16x128xf32> to vector<16x128xbf16>
    %cst_79 = arith.constant dense<0.000000e+00> : vector<16x32xf32>
    %290 = tpu.matmul %289, %158, %cst_79 {dimension_numbers = #tpu.dot_dimension_numbers<[1], [1], [0], [0], [0, 0, 1, 0], [], []>} : vector<16x128xbf16>, vector<32x128xbf16>, vector<16x32xf32> -> vector<16x32xf32>
    %291 = vector.broadcast %155 : vector<1x32xf32> to vector<16x32xf32>
    %292 = arith.addf %290, %291 : vector<16x32xf32>
    %293 = arith.addf %263, %292 : vector<16x32xf32>
    %c12 = arith.constant 12 : index
    %c0_80 = arith.constant 0 : index
    %294 = vector.load %arg4[%c12, %c0_80] : memref<14x256xf32, #tpu.memory_space<vmem>>, vector<1x32xf32>
    %c13 = arith.constant 13 : index
    %c0_81 = arith.constant 0 : index
    %295 = vector.load %arg4[%c13, %c0_81] : memref<14x256xf32, #tpu.memory_space<vmem>>, vector<1x128xf32>
    %c0_82 = arith.constant 0 : index
    %c1280 = arith.constant 1280 : index
    %296 = vector.load %arg3[%c0_82, %c1280] : memref<32x1408xbf16, #tpu.memory_space<vmem>>, vector<32x128xbf16>
    %297 = arith.mulf %293, %293 : vector<16x32xf32>
    %cst_83 = arith.constant dense<0.000000e+00> : vector<16xf32>
    %298 = vector.multi_reduction <add>, %297, %cst_83 [1] : vector<16x32xf32> to vector<16xf32>
    %299 = vector.shape_cast %298 : vector<16xf32> to vector<16x1xf32>
    %cst_84 = arith.constant 3.200000e+01 : f32
    %300 = vector.broadcast %cst_84 : f32 to vector<16x1xf32>
    %301 = arith.divf %299, %300 : vector<16x1xf32>
    %cst_85 = arith.constant 1.1920929E-7 : f32
    %302 = vector.broadcast %cst_85 : f32 to vector<16x1xf32>
    %303 = arith.addf %301, %302 : vector<16x1xf32>
    %304 = math.rsqrt %303 : vector<16x1xf32>
    %305 = vector.broadcast %304 : vector<16x1xf32> to vector<16x32xf32>
    %306 = arith.mulf %293, %305 : vector<16x32xf32>
    %307 = vector.broadcast %294 : vector<1x32xf32> to vector<16x32xf32>
    %308 = arith.mulf %306, %307 : vector<16x32xf32>
    %309 = arith.truncf %308 : vector<16x32xf32> to vector<16x32xbf16>
    %cst_86 = arith.constant dense<0.000000e+00> : vector<16x128xf32>
    %310 = tpu.matmul %309, %296, %cst_86 {dimension_numbers = #tpu.dot_dimension_numbers<[1], [0], [0], [1], [0, 0, 1, 1], [], []>} : vector<16x32xbf16>, vector<32x128xbf16>, vector<16x128xf32> -> vector<16x128xf32>
    %311 = vector.broadcast %295 : vector<1x128xf32> to vector<16x128xf32>
    %312 = arith.addf %310, %311 : vector<16x128xf32>
    %c0_87 = arith.constant 0 : index
    %c0_88 = arith.constant 0 : index
    %313 = vector.load %arg5[%c0_87, %c0_88] : memref<16x128xf32, #tpu.memory_space<vmem>>, vector<16x128xf32>
    tpu.vector_store %arg5[%c0_87, %c0_88], %312 {strides = array<i32>} : memref<16x128xf32, #tpu.memory_space<vmem>>, vector<16x128xf32>,
    return
  }
  func.func @transform_0(%arg0: i32) -> (i32, i32) {
    %c0_i32 = arith.constant 0 : i32
    %c0_i32_0 = arith.constant 0 : i32
    %c0_i32_1 = arith.constant 0 : i32
    return %c0_i32, %c0_i32_0 : i32, i32
  }
  func.func @transform_1(%arg0: i32) -> (i32, i32) {
    %c0_i32 = arith.constant 0 : i32
    %c0_i32_0 = arith.constant 0 : i32
    %c0_i32_1 = arith.constant 0 : i32
    return %c0_i32, %c0_i32_0 : i32, i32
  }
  func.func @transform_2(%arg0: i32) -> (i32, i32) {
    %c0_i32 = arith.constant 0 : i32
    %c0_i32_0 = arith.constant 0 : i32
    %c0_i32_1 = arith.constant 0 : i32
    return %c0_i32, %c0_i32_0 : i32, i32
  }
  func.func @transform_3(%arg0: i32) -> (i32, i32) {
    %c0_i32 = arith.constant 0 : i32
    %c0_i32_0 = arith.constant 0 : i32
    %c0_i32_1 = arith.constant 0 : i32
    return %c0_i32, %c0_i32_0 : i32, i32
  }
  func.func @transform_4(%arg0: i32) -> (i32, i32) {
    %c0_i32 = arith.constant 0 : i32
    %c0_i32_0 = arith.constant 0 : i32
    %c0_i32_1 = arith.constant 0 : i32
    return %c0_i32, %c0_i32_0 : i32, i32
  }
}

</mosaic_0001>

<bundles_post_ra>
// kernel: llama_forward.1
= control target key start
LH: loop header
LB: loop body
LE: loop exit
PB: predicated region body
PF: predicated region fallthrough
CT: control target
= control target key end

     0   :  { %vm47_vm0 = vcmask 261120   ;;  %v2261_v6 = vmov 0.0   ;;  %vm2262_vm1 = vmmov 0   ;;  %s2263_s24 = smov 64   ;;  %s2264_s25 = smov 32   ;;  %vm168_vm2 = vcmask 64512   ;;  %s2728_s0 = inlined_call_operand.vmem [shape: f32[16,32], index: 0, kind: input, shape index: {}]   ;;  %s2729_s2 = inlined_call_operand.vmem [shape: bf16[32,1408], index: 2, kind: input, shape index: {}]   ;;  %s2730_s1 = inlined_call_operand.vmem [shape: f32[16,80], index: 1, kind: input, shape index: {}]   ;;  %s2731_s3 = inlined_call_operand.vmem [shape: f32[14,256], index: 3, kind: input, shape index: {}]   ;;  %s2732_s4 = inlined_call_operand.vmem [shape: f32[16,128], index: 4, kind: output, shape index: {}]  }
   0x1   :  { %v2304_v0 = vld [vmem:[%s2728_s0] sm:$0xff]  ;;  %v2309_v1 = vld [vmem:[%s2728_s0 + $0x8] sm:$0xff]  ;;  %1938 = vmatprep.subr.bf16.mxu0 %v2261_v6  ;;  %1942 = vmatprep.mubr.msk.bf16.mxu0 %vm2262_vm1, %v2261_v6  ;;  %s2265_s5 = smov 96   ;;  %s2266_s6 = smov 88   ;;  %vm216_vm3 = vcmask 130048   ;;  %vm664_vm4 = vcmask 195584  }
   0x2   :  { %v45_v2 = vmul.f32 %v2304_v0, %v2304_v0  ;;  %v46_v3 = vmul.f32 %v2309_v1, %v2309_v1  ;;  %v2135_v7 = vld [vmem:[%s2729_s2] ss:$44 sps:$4 sm:$0xff]   ;;  %1946 = vmatprep.subr.bf16.mxu1 %v2261_v6  ;;  %1948 = vmatprep.mubr.msk.bf16.mxu1 %vm2262_vm1, %v2261_v6  ;;  %v2136_v8 = vld [vmem:[%s2729_s2 + $0x58] ss:$44 sps:$4 sm:$0xff]   ;;  %s2267_s7 = smov 120   ;;  %s2268_s8 = smov 104  }
   0x3   :  { %1939 = vmatpush3.bf16.msra.mxu0 %v2135_v7  ;;  %v2334_v9 = vld [vmem:[%s2730_s1] sm:$0xff]  ;;  %v2342_v10 = vld [vmem:[%s2730_s1 + $0x8] sm:$0xff]  ;;  %s2269_s9 = smov 112   ;;  %s2270_s10 = smov 80  }
   0x4   :  { %v48_v4 = vsel %vm47_vm0, %v45_v2, 0.0  ;;  %v51_v5 = vsel %vm47_vm0, %v46_v3, 0.0  ;;  %1940 = vmatprep.subr.bf16.mxu0 %v2261_v6  ;;  %145 = vrot.lane.b32.xlu1 %v2334_v9, %s2263_s24  ;;  %v22_v20 = vld [vmem:[%s2731_s3] ss:$0 sm:$0xff]  ;;  %v23_v25 = vld [vmem:[%s2731_s3 + $0x1] ss:$0 sm:$0xff] }
   0x5   :  { %49 = vadd.xlane.f32.xlu0 %v48_v4  ;;  %s2271_s11 = smov 72   ;;  %s2272_s14 = smov 8  }
   0x6   :  { %s2273_s17 = smov 16   ;;  %s2274_s18 = smov 24  }
   0x7   :  { %1941 = vmatpush3.bf16.msra.mxu0 %v2136_v8 }
   0x8   :  { %1952 = vmatprep.subr.bf16.mxu0 %v2261_v6  ;;  %147 = vrot.lane.b32.xlu1 %v2342_v10, %s2263_s24 }
   0x9   :  { %52 = vadd.xlane.f32.xlu0 %v51_v5 }
   0xc   :  { %128 = vrot.lane.b32.xlu1 %v2342_v10, %s2264_s25 }
  0x1f   :  { %126 = vrot.lane.b32.xlu0 %v2334_v9, %s2264_s25 }
  0x76   :  { %v2358_v26 = vpop.permute.xlu1 %145 }
  0x7a   :  { %v2364_v35 = vpop.permute.xlu1 %147 }
  0x7e   :  { %v2371_v39 = vpop.permute.xlu1 %128 }
  0x92   :  { %v50_v11 = vpop.xlane.xlu0 %49 }
  0x93   :  { %v55_v12 = vmul.f32 0.03125, %v50_v11 }
  0x95   :  { %v57_v13 = vadd.f32 1.1920929e-07, %v55_v12 }
  0x96   :  { %v53_v14 = vpop.xlane.xlu0 %52 }
  0x97   :  { %2161 = vrsqrt.f32 %v57_v13  ;;  %v56_v15 = vmul.f32 0.03125, %v53_v14 }
  0x99   :  { %v58_v16 = vadd.f32 1.1920929e-07, %v56_v15 }
  0x9a   :  { %v2367_v37 = vpop.permute.xlu0 %126 }
  0x9b   :  { %2163 = vrsqrt.f32 %v58_v16 }
  0xa1   :  { %v2162_v17 = vpop.eup %2161 }
  0xa2   :  { %v61_v18 = vmul.f32 %v2162_v17, %v2304_v0 }
  0xa4   :  { %v63_v22 = vmul.f32 %v61_v18, %v22_v20 }
  0xa5   :  { %v2164_v19 = vpop.eup %2163 }
  0xa6   :  { %v62_v21 = vmul.f32 %v2164_v19, %v2309_v1 }
  0xa8   :  { %v64_v23 = vmul.f32 %v62_v21, %v22_v20 }
  0xaa   :  { %v65_v24 = vpack.c.bf16 %v64_v23, %v63_v22 }
  0xac   :  { %1943 = vmatmul.mubr.msk.bf16.vlgmr.msra.gmra.mrb[0].mxu0 %vm47_vm0, %v65_v24 }
  0xad   :  { %1954 = vmatprep.mubr.msk.bf16.mxu0 %vm2262_vm1, %v2261_v6 }
 0x17f   :  { %v115_v27 = vpop.f32.mrb[0].mxu0 }
 0x180   :  { %v116_v28 = vadd.f32 %v115_v27, %v23_v25  ;;  %v1944_v29 = vpop.f32.mrb[1].mxu0 }
 0x181   :  { %v118_v30 = vpop.f32.mrb[2].mxu0 }
 0x182   :  { %v119_v31 = vadd.f32 %v118_v30, %v23_v25  ;;  %v1945_v32 = vpop.f32.mrb[3].mxu0  ;;  %v151_v33 = vmul.f32 %v2358_v26, %v116_v28  ;;  %v132_v38 = vmul.f32 %v2367_v37, %v116_v28  ;;  %v122_v47 = vmul.f32 %v116_v28, %v2334_v9 }
 0x184   :  { %155 = vrot.lane.b32.xlu1 %v151_v33, %s2263_s24  ;;  %v2362_v34 = vpack.c.bf16 %v119_v31, %v116_v28  ;;  %v152_v36 = vmul.f32 %v2364_v35, %v119_v31  ;;  %v133_v40 = vmul.f32 %v2371_v39, %v119_v31  ;;  %v123_v48 = vmul.f32 %v119_v31, %v2342_v10 }
 0x188   :  { %157 = vrot.lane.b32.xlu1 %v152_v36, %s2263_s24 }
 0x18c   :  { %136 = vrot.lane.b32.xlu1 %v132_v38, %s2263_s24 }
 0x190   :  { %138 = vrot.lane.b32.xlu1 %v133_v40, %s2263_s24 }
 0x1f6   :  { %v156_v41 = vpop.permute.xlu1 %155 }
 0x1f7   :  { %v161_v43 = vadd.f32 %v156_v41, %v132_v38 }
 0x1fa   :  { %v158_v42 = vpop.permute.xlu1 %157 }
 0x1fb   :  { %v162_v44 = vadd.f32 %v158_v42, %v133_v40 }
 0x1fd   :  { %v163_v45 = vpack.c.bf16 %v162_v44, %v161_v43 }
 0x1fe   :  { %v137_v46 = vpop.permute.xlu1 %136 }
 0x1ff   :  { %166 = vrot.lane.b32.xlu1 %v163_v45, %s2265_s5  ;;  %v142_v50 = vadd.f32 %v137_v46, %v122_v47 }
 0x202   :  { %v139_v49 = vpop.permute.xlu1 %138 }
 0x203   :  { %v143_v51 = vadd.f32 %v139_v49, %v123_v48  ;;  %404 = vrot.lane.b32.xlu1 %v163_v45, %s2266_s6 }
 0x205   :  { %v144_v52 = vpack.c.bf16 %v143_v51, %v142_v50 }
 0x207   :  { %289 = vrot.lane.b32.xlu0 %v144_v52, %s2267_s7  ;;  %523 = vrot.lane.b32.xlu1 %v144_v52, %s2268_s8 }
 0x20b   :  { %402 = vrot.lane.b32.xlu0 %v144_v52, %s2269_s9 }
 0x271   :  { %v167_v53 = vpop.permute.xlu1 %166 }
 0x272   :  { %v173_v54 = vsel %vm168_vm2, %v167_v53, 0 }
 0x273   :  { %1947 = vmatpush3.bf16.xpose.msra.mxu1 %v173_v54 }
 0x274   :  { %1958 = vmatprep.subr.bf16.mxu1 %v2261_v6 }
 0x275   :  { %v405_v55 = vpop.permute.xlu1 %404 }
 0x276   :  { %v410_v57 = vsel %vm168_vm2, %v405_v55, 0 }
 0x279   :  { %v290_v56 = vpop.permute.xlu0 %289  ;;  %v524_v59 = vpop.permute.xlu1 %523 }
 0x27a   :  { %1949 = vmatmul.mubr.msk.bf16.vlgmr.msra.gmra.mrb[0].mxu1 %vm168_vm2, %v144_v52 }
 0x27b   :  { %1959 = vmatpush3.bf16.xpose.msra.mxu1 %v173_v54  ;;  %1960 = vmatprep.mubr.msk.bf16.mxu1 %vm2262_vm1, %v2261_v6 }
 0x27c   :  { %1970 = vmatprep.subr.bf16.mxu1 %v2261_v6 }
 0x27d   :  { %v403_v58 = vpop.permute.xlu0 %402 }
 0x282   :  { %1961 = vmatmul.mubr.msk.bf16.vlgmr.msra.gmra.mrb[4].mxu1 %vm168_vm2, %v290_v56 }
 0x283   :  { %1971 = vmatpush3.bf16.xpose.msra.mxu1 %v410_v57  ;;  %1972 = vmatprep.mubr.msk.bf16.mxu1 %vm2262_vm1, %v2261_v6 }
 0x284   :  { %1982 = vmatprep.subr.bf16.mxu1 %v2261_v6 }
 0x28a   :  { %1973 = vmatmul.mubr.msk.bf16.vlgmr.msra.gmra.mrb[8].mxu1 %vm168_vm2, %v403_v58 }
 0x28b   :  { %1983 = vmatpush3.bf16.xpose.msra.mxu1 %v410_v57  ;;  %1984 = vmatprep.mubr.msk.bf16.mxu1 %vm2262_vm1, %v2261_v6 }
 0x28c   :  { %1994 = vmatprep.subr.bf16.mxu1 %v2261_v6 }
 0x292   :  { %1985 = vmatmul.mubr.msk.bf16.vlgmr.msra.gmra.mrb[12].mxu1 %vm168_vm2, %v524_v59 }
 0x293   :  { %1998 = vmatprep.mubr.msk.bf16.mxu1 %vm2262_vm1, %v2261_v6 }
 0x34d   :  { %v209_v60 = vpop.f32.mrb[0].mxu1 }
 0x34e   :  { %v210_v61 = vadd.f32 %v209_v60, %v2358_v26  ;;  %v1950_v62 = vpop.f32.mrb[1].mxu1 }
 0x34f   :  { %v212_v63 = vpop.f32.mrb[2].mxu1 }
 0x350   :  { %v213_v2 = vadd.f32 %v212_v63, %v2364_v35  ;;  %v1951_v3 = vpop.f32.mrb[3].mxu1  ;;  %v217_v4 = vsel %vm216_vm3, %v210_v61, -inf }
 0x351   :  { %218 = vmax.xlane.f32.xlu0 %v217_v4 }
 0x352   :  { %v220_v5 = vsel %vm216_vm3, %v213_v2, -inf }
 0x353   :  { %221 = vmax.xlane.f32.xlu1 %v220_v5 }
 0x355   :  { %v328_v7 = vpop.f32.mrb[4].mxu1 }
 0x356   :  { %v329_v8 = vadd.f32 %v328_v7, %v2358_v26  ;;  %v1962_v11 = vpop.f32.mrb[5].mxu1 }
 0x357   :  { %v331_v12 = vpop.f32.mrb[6].mxu1 }
 0x358   :  { %v332_v13 = vadd.f32 %v331_v12, %v2364_v35  ;;  %v1963_v14 = vpop.f32.mrb[7].mxu1  ;;  %v335_v15 = vsel %vm216_vm3, %v329_v8, -inf }
 0x359   :  { %336 = vmax.xlane.f32.xlu0 %v335_v15 }
 0x35a   :  { %v338_v16 = vsel %vm216_vm3, %v332_v13, -inf }
 0x35d   :  { %339 = vmax.xlane.f32.xlu0 %v338_v16  ;;  %v446_v17 = vpop.f32.mrb[8].mxu1 }
 0x35e   :  { %v447_v18 = vadd.f32 %v446_v17, %v2358_v26  ;;  %v1974_v19 = vpop.f32.mrb[9].mxu1 }
 0x35f   :  { %v449_v20 = vpop.f32.mrb[10].mxu1 }
 0x360   :  { %v450_v21 = vadd.f32 %v449_v20, %v2364_v35  ;;  %v1975_v22 = vpop.f32.mrb[11].mxu1  ;;  %v453_v23 = vsel %vm216_vm3, %v447_v18, -inf }
 0x361   :  { %454 = vmax.xlane.f32.xlu1 %v453_v23 }
 0x362   :  { %v456_v24 = vsel %vm216_vm3, %v450_v21, -inf }
 0x363   :  { %457 = vmax.xlane.f32.xlu0 %v456_v24 }
 0x365   :  { %v562_v25 = vpop.f32.mrb[12].mxu1 }
 0x366   :  { %v563_v27 = vadd.f32 %v562_v25, %v2358_v26  ;;  %v1986_v28 = vpop.f32.mrb[13].mxu1 }
 0x367   :  { %v565_v29 = vpop.f32.mrb[14].mxu1 }
 0x368   :  { %v566_v30 = vadd.f32 %v565_v29, %v2364_v35  ;;  %v1987_v31 = vpop.f32.mrb[15].mxu1  ;;  %v569_v32 = vsel %vm216_vm3, %v563_v27, -inf }
 0x369   :  { %570 = vmax.xlane.f32.xlu1 %v569_v32 }
 0x36a   :  { %v572_v33 = vsel %vm216_vm3, %v566_v30, -inf }
 0x36b   :  { %573 = vmax.xlane.f32.xlu0 %v572_v33 }
 0x3de   :  { %v219_v36 = vpop.xlane.xlu0 %218 }
 0x3df   :  { %v223_v38 = vsub.f32 %v210_v61, %v219_v36 }
 0x3e0   :  { %v222_v40 = vpop.xlane.xlu1 %221 }
 0x3e1   :  { %v225_v41 = vmul.f32 1.442695, %v223_v38  ;;  %v224_v42 = vsub.f32 %v213_v2, %v222_v40 }
 0x3e3   :  { %2165 = vpow2.f32 %v225_v41  ;;  %v227_v43 = vmul.f32 1.442695, %v224_v42 }
 0x3e5   :  { %2167 = vpow2.f32 %v227_v43 }
 0x3e6   :  { %v337_v44 = vpop.xlane.xlu0 %336 }
 0x3e7   :  { %v341_v45 = vsub.f32 %v329_v8, %v337_v44 }
 0x3e9   :  { %v343_v46 = vmul.f32 1.442695, %v341_v45 }
 0x3ea   :  { %v340_v47 = vpop.xlane.xlu0 %339 }
 0x3eb   :  { %2169 = vpow2.f32 %v343_v46  ;;  %v342_v48 = vsub.f32 %v332_v13, %v340_v47 }
 0x3ed   :  { %v2166_v49 = vpop.eup %2165  ;;  %v345_v50 = vmul.f32 1.442695, %v342_v48 }
 0x3ee   :  { %v455_v51 = vpop.xlane.xlu1 %454  ;;  %v229_v52 = vsel %vm216_vm3, %v2166_v49, 0.0 }
 0x3ef   :  { %v2168_v53 = vpop.eup %2167  ;;  %2171 = vpow2.f32 %v345_v50  ;;  %v459_v54 = vsub.f32 %v447_v18, %v455_v51  ;;  %230 = vadd.xlane.f32.xlu1 %v229_v52 }
 0x3f0   :  { %v458_v55 = vpop.xlane.xlu0 %457  ;;  %v232_v56 = vsel %vm216_vm3, %v2168_v53, 0.0 }
 0x3f1   :  { %v461_v57 = vmul.f32 1.442695, %v459_v54  ;;  %v460_v58 = vsub.f32 %v450_v21, %v458_v55  ;;  %233 = vadd.xlane.f32.xlu0 %v232_v56 }
 0x3f3   :  { %2173 = vpow2.f32 %v461_v57  ;;  %v463_v59 = vmul.f32 1.442695, %v460_v58 }
 0x3f5   :  { %v2170_v60 = vpop.eup %2169  ;;  %2175 = vpow2.f32 %v463_v59 }
 0x3f6   :  { %v571_v61 = vpop.xlane.xlu1 %570  ;;  %v347_v62 = vsel %vm216_vm3, %v2170_v60, 0.0 }
 0x3f7   :  { %v575_v63 = vsub.f32 %v563_v27, %v571_v61  ;;  %348 = vadd.xlane.f32.xlu1 %v347_v62 }
 0x3f8   :  { %v574_v2 = vpop.xlane.xlu0 %573 }
 0x3f9   :  { %v2172_v3 = vpop.eup %2171  ;;  %v577_v4 = vmul.f32 1.442695, %v575_v63  ;;  %v576_v5 = vsub.f32 %v566_v30, %v574_v2 }
 0x3fa   :  { %v350_v7 = vsel %vm216_vm3, %v2172_v3, 0.0 }
 0x3fb   :  { %2177 = vpow2.f32 %v577_v4  ;;  %v579_v8 = vmul.f32 1.442695, %v576_v5  ;;  %351 = vadd.xlane.f32.xlu0 %v350_v7 }
 0x3fd   :  { %v2174_v11 = vpop.eup %2173  ;;  %2179 = vpow2.f32 %v579_v8 }
 0x3fe   :  { %v465_v12 = vsel %vm216_vm3, %v2174_v11, 0.0 }
 0x3ff   :  { %v2176_v13 = vpop.eup %2175  ;;  %466 = vadd.xlane.f32.xlu1 %v465_v12 }
 0x400   :  { %v468_v14 = vsel %vm216_vm3, %v2176_v13, 0.0 }
 0x401   :  { %469 = vadd.xlane.f32.xlu0 %v468_v14 }
 0x405   :  { %v2178_v15 = vpop.eup %2177 }
 0x406   :  { %v581_v16 = vsel %vm216_vm3, %v2178_v15, 0.0 }
 0x407   :  { %v2180_v17 = vpop.eup %2179  ;;  %582 = vadd.xlane.f32.xlu1 %v581_v16 }
 0x408   :  { %v584_v18 = vsel %vm216_vm3, %v2180_v17, 0.0 }
 0x409   :  { %585 = vadd.xlane.f32.xlu0 %v584_v18 }
 0x418   :  { %241 = vrot.lane.b32.xlu1 %v2362_v34, %s2270_s10 }
 0x41f   :  { %476 = vrot.lane.b32.xlu0 %v2362_v34, %s2271_s11 }
 0x47c   :  { %v231_v20 = vpop.xlane.xlu1 %230 }
 0x47e   :  { %v234_v19 = vpop.xlane.xlu0 %233 }
 0x47f   :  { %2181 = vrcp.f32 %v234_v19 }
 0x480   :  { %2183 = vrcp.f32 %v231_v20 }
 0x484   :  { %v349_v21 = vpop.xlane.xlu1 %348 }
 0x488   :  { %v352_v22 = vpop.xlane.xlu0 %351 }
 0x489   :  { %2185 = vrcp.f32 %v352_v22  ;;  %v2182_v24 = vpop.eup %2181 }
 0x48a   :  { %2187 = vrcp.f32 %v349_v21  ;;  %v2184_v27 = vpop.eup %2183  ;;  %v238_v28 = vmul.f32 %v2182_v24, %v2168_v53 }
 0x48b   :  { %v237_v30 = vmul.f32 %v2184_v27, %v2166_v49 }
 0x48c   :  { %v467_v23 = vpop.xlane.xlu1 %466 }
 0x48d   :  { %v239_v32 = vpack.c.bf16 %v238_v28, %v237_v30 }
 0x48e   :  { %v470_v29 = vpop.xlane.xlu0 %469 }
 0x48f   :  { %2189 = vrcp.f32 %v470_v29 }
 0x490   :  { %2191 = vrcp.f32 %v467_v23 }
 0x493   :  { %v2186_v34 = vpop.eup %2185 }
 0x494   :  { %v583_v25 = vpop.xlane.xlu1 %582  ;;  %v2188_v33 = vpop.eup %2187  ;;  %v356_v36 = vmul.f32 %v2186_v34, %v2172_v3  ;;  %v2138_v3 = vld [vmem:[%s2729_s2 + $0x68] ss:$44 sps:$4 sm:$0xff]  }
 0x495   :  { %v355_v40 = vmul.f32 %v2188_v33, %v2170_v60  ;;  %v2137_v60 = vld [vmem:[%s2729_s2 + $0x10] ss:$44 sps:$4 sm:$0xff]  }
 0x496   :  { %v586_v38 = vpop.xlane.xlu0 %585  ;;  %1995 = vmatpush3.bf16.msra.mxu1 %v2137_v60  ;;  %v25_v60 = vld [vmem:[%s2731_s3 + $0x3] ss:$0 sm:$0xff] }
 0x497   :  { %2193 = vrcp.f32 %v586_v38  ;;  %v357_v41 = vpack.c.bf16 %v356_v36, %v355_v40  ;;  %1996 = vmatprep.subr.bf16.mxu1 %v2261_v6 }
 0x498   :  { %v242_v31 = vpop.permute.xlu1 %241  ;;  %2195 = vrcp.f32 %v583_v25 }
 0x499   :  { %1953 = vmatpush3.bf16.msra.mxu0 %v242_v31  ;;  %v2190_v42 = vpop.eup %2189 }
 0x49a   :  { %1964 = vmatprep.subr.bf16.mxu0 %v2261_v6  ;;  %v477_v43 = vpop.permute.xlu0 %476  ;;  %v2192_v44 = vpop.eup %2191  ;;  %v474_v45 = vmul.f32 %v2190_v42, %v2176_v13  ;;  %1997 = vmatpush3.bf16.msra.mxu1 %v2138_v3  ;;  %v2145_v3 = vld [vmem:[%s2729_s2 + $0xc] ss:$44 sps:$4 sm:$0xff]  }
 0x49b   :  { %v473_v46 = vmul.f32 %v2192_v44, %v2174_v11  ;;  %2002 = vmatprep.subr.bf16.mxu1 %v2261_v6 }
 0x49c   :  { %1955 = vmatmul.mubr.msk.bf16.vlgmr.msra.gmra.mrb[4].mxu0 %vm216_vm3, %v239_v32  ;;  %v24_v32 = vld [vmem:[%s2731_s3 + $0x2] ss:$0 sm:$0xff] }
 0x49d   :  { %1965 = vmatpush3.bf16.msra.mxu0 %v242_v31  ;;  %1966 = vmatprep.mubr.msk.bf16.mxu0 %vm2262_vm1, %v2261_v6  ;;  %v475_v47 = vpack.c.bf16 %v474_v45, %v473_v46 }
 0x49e   :  { %1976 = vmatprep.subr.bf16.mxu0 %v2261_v6 }
 0x4a1   :  { %v2194_v48 = vpop.eup %2193 }
 0x4a2   :  { %v2196_v49 = vpop.eup %2195  ;;  %v590_v50 = vmul.f32 %v2194_v48, %v2180_v17  ;;  %v2142_v48 = vld [vmem:[%s2729_s2 + $0x5c] ss:$44 sps:$4 sm:$0xff]  }
 0x4a3   :  { %v589_v51 = vmul.f32 %v2196_v49, %v2178_v15  ;;  %v2144_v49 = vld [vmem:[%s2729_s2 + $0x60] ss:$44 sps:$4 sm:$0xff]  }
 0x4a4   :  { %1967 = vmatmul.mubr.msk.bf16.vlgmr.msra.gmra.mrb[8].mxu0 %vm216_vm3, %v357_v41 }
 0x4a5   :  { %1977 = vmatpush3.bf16.msra.mxu0 %v477_v43  ;;  %1978 = vmatprep.mubr.msk.bf16.mxu0 %vm2262_vm1, %v2261_v6  ;;  %v591_v52 = vpack.c.bf16 %v590_v50, %v589_v51  ;;  %v2275_v50 = vmov 0  }
 0x4a6   :  { %1988 = vmatprep.subr.bf16.mxu0 %v2261_v6 }
 0x4ac   :  { %1979 = vmatmul.mubr.msk.bf16.vlgmr.msra.gmra.mrb[12].mxu0 %vm216_vm3, %v475_v47 }
 0x4ad   :  { %1989 = vmatpush3.bf16.msra.mxu0 %v477_v43  ;;  %1990 = vmatprep.mubr.msk.bf16.mxu0 %vm2262_vm1, %v2261_v6 }
 0x4b4   :  { %1991 = vmatmul.mubr.msk.bf16.vlgmr.msra.gmra.mrb[16].mxu0 %vm216_vm3, %v591_v52 }
 0x4b5   :  { %811 = vmatprep.mubr.bf16.mxu0 %v2275_v50 }
 0x56f   :  { %v281_v53 = vpop.f32.mrb[4].mxu0 }
 0x570   :  { %v1956_v54 = vpop.f32.mrb[5].mxu0 }
 0x571   :  { %v284_v55 = vpop.f32.mrb[6].mxu0 }
 0x572   :  { %v1957_v56 = vpop.f32.mrb[7].mxu0 }
 0x577   :  { %v395_v57 = vpop.f32.mrb[8].mxu0 }
 0x578   :  { %v1968_v58 = vpop.f32.mrb[9].mxu0 }
 0x579   :  { %v398_v59 = vpop.f32.mrb[10].mxu0 }
 0x57a   :  { %v2105_v61 = vpack.i.bf16 %v398_v59, %v395_v57  ;;  %v1969_v62 = vpop.f32.mrb[11].mxu0 }
 0x57c   :  { %2106 = vrot.lane.b32.xlu1 %v2105_v61, %s2272_s14 }
 0x57f   :  { %v516_v63 = vpop.f32.mrb[12].mxu0 }
 0x580   :  { %v1980_v2 = vpop.f32.mrb[13].mxu0 }
 0x581   :  { %v519_v4 = vpop.f32.mrb[14].mxu0 }
 0x582   :  { %v2110_v5 = vpack.i.bf16 %v519_v4, %v516_v63  ;;  %v1981_v7 = vpop.f32.mrb[15].mxu0  ;;  %v2146_v4 = vld [vmem:[%s2729_s2 + $0x64] ss:$44 sps:$4 sm:$0xff]  }
 0x584   :  { %2111 = vrot.lane.b32.xlu1 %v2110_v5, %s2273_s17  ;;  %v746_v5 = vlaneseq }
 0x586   :  { %v2507_v7 = vshrl.u32 %v746_v5, 7 }
 0x587   :  { %v629_v8 = vpop.f32.mrb[16].mxu0 }
 0x588   :  { %v1992_v11 = vpop.f32.mrb[17].mxu0 }
 0x589   :  { %v632_v12 = vpop.f32.mrb[18].mxu0  ;;  %v1834_v11 = vld [vmem:[%s2731_s3 + $0x4] ss:$8 sm:$0x3] }
 0x58a   :  { %v2115_v13 = vpack.i.bf16 %v632_v12, %v629_v8  ;;  %v1993_v14 = vpop.f32.mrb[19].mxu0  ;;  %v752_v8 = vsub.s32 1, %v2507_v7 }
 0x58c   :  { %2116 = vrot.lane.b32.xlu0 %v2115_v13, %s2274_s18  ;;  %v753_v12 = vrot.slane %v1834_v11, %v752_v8 }
 0x5ee   :  { %v2107_v15 = vpop.permute.xlu1 %2106 }
 0x5ef   :  { %v2109_v17 = vunpack.i.h.bf16 %v2107_v15  ;;  %v2108_v18 = vunpack.i.l.bf16 %v2107_v15 }
 0x5f1   :  { %v661_v22 = vsel %vm168_vm2, %v284_v55, %v2109_v17  ;;  %v660_v23 = vsel %vm168_vm2, %v281_v53, %v2108_v18 }
 0x5f6   :  { %v2112_v16 = vpop.permute.xlu1 %2111 }
 0x5f7   :  { %v2114_v19 = vunpack.i.h.bf16 %v2112_v16  ;;  %v2113_v20 = vunpack.i.l.bf16 %v2112_v16 }
 0x5f9   :  { %v663_v27 = vsel %vm216_vm3, %v661_v22, %v2114_v19  ;;  %v662_v28 = vsel %vm216_vm3, %v660_v23, %v2113_v20 }
 0x5fe   :  { %v2117_v21 = vpop.permute.xlu0 %2116 }
 0x5ff   :  { %v2119_v24 = vunpack.i.h.bf16 %v2117_v21  ;;  %v2118_v25 = vunpack.i.l.bf16 %v2117_v21 }
 0x601   :  { %v666_v29 = vsel %vm664_vm4, %v663_v27, %v2119_v24  ;;  %v665_v30 = vsel %vm664_vm4, %v662_v28, %v2118_v25  ;;  %v748_v25 = vsub.s32 0, %v2507_v7 }
 0x602   :  { %v667_v31 = vpack.c.bf16 %v666_v29, %v665_v30 }
 0x603   :  { %v749_v27 = vrot.slane %v1834_v11, %v748_v25  ;;  %v895_v11 = vld [vmem:[%s2731_s3 + $0x7] ss:$0 sm:$0xff] }
 0x604   :  { %1999 = vmatmul.mubr.msk.bf16.vlgmr.msra.gmra.mrb[16].mxu1 %vm47_vm0, %v667_v31 }
 0x605   :  { %2006 = vmatprep.mubr.msk.bf16.mxu1 %vm2262_vm1, %v2261_v6  ;;  %2003 = vmatpush3.bf16.xpose.msra.mxu1 %v2145_v3 }
 0x606   :  { %2004 = vmatprep.subr.bf16.mxu1 %v2261_v6 }
 0x60d   :  { %2005 = vmatpush3.bf16.xpose.msra.mxu1 %v2146_v4 }
 0x60e   :  { %2024 = vmatprep.subr.bf16.mxu1 %v2261_v6 }
 0x6d7   :  { %v717_v34 = vpop.f32.mrb[16].mxu1 }
 0x6d8   :  { %v718_v33 = vadd.f32 %v717_v34, %v24_v32  ;;  %v2000_v36 = vpop.f32.mrb[17].mxu1 }
 0x6d9   :  { %v720_v38 = vpop.f32.mrb[18].mxu1 }
 0x6da   :  { %v2466_v40 = vadd.f32 %v718_v33, %v2304_v0  ;;  %v721_v41 = vadd.f32 %v720_v38, %v24_v32  ;;  %v2001_v42 = vpop.f32.mrb[19].mxu1  ;;  %v2141_v0 = vld [vmem:[%s2729_s2 + $0x8] ss:$44 sps:$4 sm:$0xff]  }
 0x6db   :  { %779 = vmatprep.subr.bf16.mxu0 %v2141_v0 }
 0x6dc   :  { %v2469_v43 = vadd.f32 %v721_v41, %v2309_v1  ;;  %v726_v44 = vmul.f32 %v2466_v40, %v2466_v40  ;;  %v2139_v1 = vld [vmem:[%s2729_s2 + $0x4] ss:$44 sps:$4 sm:$0xff]  }
 0x6dd   :  { %780 = vmatpush1.bf16.msra.mxu0 %v2139_v1  ;;  %v28_v41 = vld [vmem:[%s2731_s3 + $0x5] ss:$0 sm:$0xff] }
 0x6de   :  { %v728_v45 = vsel %vm47_vm0, %v726_v44, 0.0  ;;  %v727_v46 = vmul.f32 %v2469_v43, %v2469_v43  ;;  %781 = vmatprep.subr.bf16.mxu0 %v2144_v49 }
 0x6df   :  { %729 = vadd.xlane.f32.xlu1 %v728_v45 }
 0x6e0   :  { %v731_v47 = vsel %vm47_vm0, %v727_v46, 0.0 }
 0x6e1   :  { %732 = vadd.xlane.f32.xlu0 %v731_v47  ;;  %782 = vmatpush1.bf16.msra.mxu0 %v2142_v48 }
 0x6e2   :  { %2010 = vmatprep.subr.bf16.mxu0 %v2261_v6 }
 0x76c   :  { %v730_v51 = vpop.xlane.xlu1 %729 }
 0x76d   :  { %v734_v52 = vmul.f32 0.03125, %v730_v51 }
 0x76e   :  { %v733_v53 = vpop.xlane.xlu0 %732 }
 0x76f   :  { %v736_v54 = vadd.f32 1.1920929e-07, %v734_v52  ;;  %v735_v55 = vmul.f32 0.03125, %v733_v53 }
 0x771   :  { %2197 = vrsqrt.f32 %v736_v54  ;;  %v737_v56 = vadd.f32 1.1920929e-07, %v735_v55 }
 0x773   :  { %2199 = vrsqrt.f32 %v737_v56 }
 0x77b   :  { %v2198_v57 = vpop.eup %2197 }
 0x77c   :  { %v740_v58 = vmul.f32 %v2198_v57, %v2466_v40 }
 0x77d   :  { %v2200_v59 = vpop.eup %2199 }
 0x77e   :  { %v741_v61 = vmul.f32 %v2200_v59, %v2469_v43  ;;  %v742_v62 = vmul.f32 %v740_v58, %v25_v60 }
 0x780   :  { %v743_v63 = vmul.f32 %v741_v61, %v25_v60 }
 0x782   :  { %v744_v2 = vpack.c.bf16 %v743_v63, %v742_v62  ;;  %v894_v63 = vld [vmem:[%s2731_s3 + $0x6] ss:$0 sm:$0xff] }
 0x784   :  { %1853 = vmatmul.mubr.msk.bf16.vlgmr.msra.gmra.mrb[20].mxu0 %vm47_vm0, %v744_v2 }
 0x785   :  { %2014 = vmatprep.mubr.msk.bf16.mxu0 %vm2262_vm1, %v2261_v6 }
 0x857   :  { %v813_v13 = vpop.f32.mrb[20].mxu0 }
 0x858   :  { %v815_v14 = vpop.f32.mrb[21].mxu0  ;;  %v814_v29 = vadd.f32 %v813_v13, %v749_v27 }
 0x859   :  { %v816_v15 = vadd.f32 %v815_v14, %v753_v12  ;;  %v817_v16 = vpop.f32.mrb[22].mxu0 }
 0x85a   :  { %v819_v17 = vpop.f32.mrb[23].mxu0  ;;  %v818_v34 = vadd.f32 %v817_v16, %v749_v27 }
 0x85b   :  { %v1854_v18 = vmul.f32 -1.442695, %v816_v15  ;;  %v820_v19 = vadd.f32 %v819_v17, %v753_v12 }
 0x85d   :  { %2201 = vpow2.f32 %v1854_v18  ;;  %v1855_v20 = vmul.f32 -1.442695, %v820_v19 }
 0x85f   :  { %2203 = vpow2.f32 %v1855_v20 }
 0x867   :  { %v2202_v21 = vpop.eup %2201 }
 0x868   :  { %v828_v22 = vadd.f32 1.0, %v2202_v21 }
 0x869   :  { %v2204_v23 = vpop.eup %2203 }
 0x86a   :  { %2205 = vrcp.f32 %v828_v22  ;;  %v829_v24 = vadd.f32 1.0, %v2204_v23 }
 0x86c   :  { %2207 = vrcp.f32 %v829_v24 }
 0x874   :  { %v2206_v28 = vpop.eup %2205 }
 0x875   :  { %v834_v30 = vmul.f32 %v2206_v28, %v816_v15 }
 0x876   :  { %v2208_v31 = vpop.eup %2207 }
 0x877   :  { %v836_v32 = vmul.f32 %v834_v30, %v814_v29  ;;  %v835_v33 = vmul.f32 %v2208_v31, %v820_v19 }
 0x879   :  { %v837_v36 = vmul.f32 %v835_v33, %v818_v34 }
 0x87b   :  { %v838_v38 = vpack.c.bf16 %v837_v36, %v836_v32 }
 0x87d   :  { %2007 = vmatmul.mubr.bf16.vlgmr.msra.gmra.mrb[20].mxu1 %v838_v38 }
 0x87e   :  { %2026 = vmatprep.mubr.msk.bf16.mxu1 %vm2262_vm1, %v2261_v6 }
 0x950   :  { %v885_v42 = vpop.f32.mrb[20].mxu1 }
 0x951   :  { %v886_v44 = vadd.f32 %v885_v42, %v28_v41  ;;  %v2008_v45 = vpop.f32.mrb[21].mxu1 }
 0x952   :  { %v888_v46 = vpop.f32.mrb[22].mxu1 }
 0x953   :  { %v2524_v47 = vadd.f32 %v886_v44, %v2466_v40  ;;  %v889_v0 = vadd.f32 %v888_v46, %v28_v41  ;;  %v2009_v1 = vpop.f32.mrb[23].mxu1  ;;  %v2147_v40 = vld [vmem:[%s2729_s2 + $0x14] ss:$44 sps:$4 sm:$0xff]  }
 0x954   :  { %2011 = vmatpush3.bf16.msra.mxu0 %v2147_v40 }
 0x955   :  { %v2527_v48 = vadd.f32 %v889_v0, %v2469_v43  ;;  %v917_v49 = vmul.f32 %v2524_v47, %v2524_v47  ;;  %v2148_v43 = vld [vmem:[%s2729_s2 + $0x6c] ss:$44 sps:$4 sm:$0xff]   ;;  %2012 = vmatprep.subr.bf16.mxu0 %v2261_v6 }
 0x957   :  { %v919_v51 = vsel %vm47_vm0, %v917_v49, 0.0  ;;  %v918_v52 = vmul.f32 %v2527_v48, %v2527_v48 }
 0x958   :  { %920 = vadd.xlane.f32.xlu0 %v919_v51  ;;  %2013 = vmatpush3.bf16.msra.mxu0 %v2148_v43 }
 0x959   :  { %v922_v53 = vsel %vm47_vm0, %v918_v52, 0.0  ;;  %2018 = vmatprep.subr.bf16.mxu0 %v2261_v6 }
 0x95a   :  { %923 = vadd.xlane.f32.xlu1 %v922_v53 }
 0x9e5   :  { %v921_v54 = vpop.xlane.xlu0 %920 }
 0x9e6   :  { %v925_v55 = vmul.f32 0.03125, %v921_v54 }
 0x9e7   :  { %v924_v56 = vpop.xlane.xlu1 %923 }
 0x9e8   :  { %v927_v57 = vadd.f32 1.1920929e-07, %v925_v55  ;;  %v926_v58 = vmul.f32 0.03125, %v924_v56 }
 0x9ea   :  { %2209 = vrsqrt.f32 %v927_v57  ;;  %v928_v59 = vadd.f32 1.1920929e-07, %v926_v58 }
 0x9ec   :  { %2211 = vrsqrt.f32 %v928_v59 }
 0x9f4   :  { %v2210_v60 = vpop.eup %2209 }
 0x9f5   :  { %v931_v61 = vmul.f32 %v2210_v60, %v2524_v47 }
 0x9f6   :  { %v2212_v62 = vpop.eup %2211 }
 0x9f7   :  { %v932_v2 = vmul.f32 %v2212_v62, %v2527_v48  ;;  %v933_v3 = vmul.f32 %v931_v61, %v894_v63 }
 0x9f9   :  { %v934_v4 = vmul.f32 %v932_v2, %v894_v63 }
 0x9fb   :  { %v935_v5 = vpack.c.bf16 %v934_v4, %v933_v3 }
 0x9fd   :  { %2015 = vmatmul.mubr.msk.bf16.vlgmr.msra.gmra.mrb[24].mxu0 %vm47_vm0, %v935_v5 }
 0x9fe   :  { %2020 = vmatprep.mubr.msk.bf16.mxu0 %vm2262_vm1, %v2261_v6 }
 0xad0   :  { %v985_v12 = vpop.f32.mrb[24].mxu0 }
 0xad1   :  { %v986_v13 = vadd.f32 %v985_v12, %v895_v11  ;;  %v2016_v14 = vpop.f32.mrb[25].mxu0 }
 0xad2   :  { %v988_v15 = vpop.f32.mrb[26].mxu0 }
 0xad3   :  { %v989_v16 = vadd.f32 %v988_v15, %v895_v11  ;;  %v2017_v17 = vpop.f32.mrb[27].mxu0  ;;  %v1007_v18 = vmul.f32 %v986_v13, %v2358_v26  ;;  %v994_v22 = vmul.f32 %v986_v13, %v2367_v37  ;;  %v992_v32 = vmul.f32 %v986_v13, %v2334_v9 }
 0xad5   :  { %1011 = vrot.lane.b32.xlu0 %v1007_v18, %s2263_s24  ;;  %v1008_v19 = vmul.f32 %v989_v16, %v2364_v35  ;;  %v2557_v20 = vpack.c.bf16 %v989_v16, %v986_v13  ;;  %v995_v21 = vmul.f32 %v989_v16, %v2371_v39  ;;  %v993_v31 = vmul.f32 %v989_v16, %v2342_v10 }
 0xad7   :  { %1013 = vrot.lane.b32.xlu1 %v1008_v19, %s2263_s24 }
 0xad9   :  { %1000 = vrot.lane.b32.xlu0 %v995_v21, %s2263_s24 }
 0xadb   :  { %998 = vrot.lane.b32.xlu1 %v994_v22, %s2263_s24 }
 0xb47   :  { %v1012_v23 = vpop.permute.xlu0 %1011 }
 0xb48   :  { %v1017_v27 = vadd.f32 %v1012_v23, %v994_v22 }
 0xb49   :  { %v1014_v24 = vpop.permute.xlu1 %1013 }
 0xb4a   :  { %v1018_v28 = vadd.f32 %v1014_v24, %v995_v21 }
 0xb4b   :  { %v1001_v29 = vpop.permute.xlu0 %1000 }
 0xb4c   :  { %v1019_v30 = vpack.c.bf16 %v1018_v28, %v1017_v27  ;;  %v1005_v33 = vadd.f32 %v1001_v29, %v993_v31 }
 0xb4d   :  { %v999_v34 = vpop.permute.xlu1 %998 }
 0xb4e   :  { %v1004_v36 = vadd.f32 %v999_v34, %v992_v32  ;;  %1022 = vrot.lane.b32.xlu1 %v1019_v30, %s2265_s5 }
 0xb50   :  { %v1006_v39 = vpack.c.bf16 %v1005_v33, %v1004_v36 }
 0xb52   :  { %1258 = vrot.lane.b32.xlu1 %v1019_v30, %s2266_s6  ;;  %1143 = vrot.lane.b32.xlu0 %v1006_v39, %s2267_s7 }
 0xb56   :  { %1377 = vrot.lane.b32.xlu1 %v1006_v39, %s2268_s8  ;;  %1256 = vrot.lane.b32.xlu0 %v1006_v39, %s2269_s9 }
 0xbc0   :  { %v1023_v37 = vpop.permute.xlu1 %1022 }
 0xbc1   :  { %v1028_v38 = vsel %vm168_vm2, %v1023_v37, 0 }
 0xbc2   :  { %2019 = vmatpush3.bf16.xpose.msra.mxu0 %v1028_v38 }
 0xbc3   :  { %2030 = vmatprep.subr.bf16.mxu0 %v2261_v6 }
 0xbc4   :  { %v1259_v9 = vpop.permute.xlu1 %1258  ;;  %v1144_v10 = vpop.permute.xlu0 %1143 }
 0xbc5   :  { %v1264_v41 = vsel %vm168_vm2, %v1259_v9, 0 }
 0xbc8   :  { %v1257_v42 = vpop.permute.xlu0 %1256  ;;  %v1378_v44 = vpop.permute.xlu1 %1377 }
 0xbc9   :  { %2021 = vmatmul.mubr.msk.bf16.vlgmr.msra.gmra.mrb[28].mxu0 %vm168_vm2, %v1006_v39 }
 0xbca   :  { %2031 = vmatpush3.bf16.xpose.msra.mxu0 %v1028_v38  ;;  %2032 = vmatprep.mubr.msk.bf16.mxu0 %vm2262_vm1, %v2261_v6 }
 0xbcb   :  { %2042 = vmatprep.subr.bf16.mxu0 %v2261_v6 }
 0xbd1   :  { %2033 = vmatmul.mubr.msk.bf16.vlgmr.msra.gmra.mrb[32].mxu0 %vm168_vm2, %v1144_v10 }
 0xbd2   :  { %2043 = vmatpush3.bf16.xpose.msra.mxu0 %v1264_v41  ;;  %2044 = vmatprep.mubr.msk.bf16.mxu0 %vm2262_vm1, %v2261_v6 }
 0xbd3   :  { %2054 = vmatprep.subr.bf16.mxu0 %v2261_v6 }
 0xbd9   :  { %2045 = vmatmul.mubr.msk.bf16.vlgmr.msra.gmra.mrb[36].mxu0 %vm168_vm2, %v1257_v42 }
 0xbda   :  { %2055 = vmatpush3.bf16.xpose.msra.mxu0 %v1264_v41  ;;  %2056 = vmatprep.mubr.msk.bf16.mxu0 %vm2262_vm1, %v2261_v6 }
 0xbdb   :  { %2066 = vmatprep.subr.bf16.mxu0 %v2261_v6 }
 0xbe1   :  { %2057 = vmatmul.mubr.msk.bf16.vlgmr.msra.gmra.mrb[40].mxu0 %vm168_vm2, %v1378_v44 }
 0xbe2   :  { %2070 = vmatprep.mubr.msk.bf16.mxu0 %vm2262_vm1, %v2261_v6 }
 0xc9c   :  { %v1064_v45 = vpop.f32.mrb[28].mxu0 }
 0xc9d   :  { %v1065_v46 = vadd.f32 %v1064_v45, %v2358_v26  ;;  %v2022_v0 = vpop.f32.mrb[29].mxu0 }
 0xc9e   :  { %v1067_v1 = vpop.f32.mrb[30].mxu0 }
 0xc9f   :  { %v1068_v49 = vadd.f32 %v1067_v1, %v2364_v35  ;;  %v2023_v51 = vpop.f32.mrb[31].mxu0  ;;  %v1071_v52 = vsel %vm216_vm3, %v1065_v46, -inf }
 0xca0   :  { %1072 = vmax.xlane.f32.xlu0 %v1071_v52 }
 0xca1   :  { %v1074_v53 = vsel %vm216_vm3, %v1068_v49, -inf }
 0xca2   :  { %1075 = vmax.xlane.f32.xlu1 %v1074_v53 }
 0xca4   :  { %v1182_v40 = vpop.f32.mrb[32].mxu0 }
 0xca5   :  { %v1183_v43 = vadd.f32 %v1182_v40, %v2358_v26  ;;  %v2034_v54 = vpop.f32.mrb[33].mxu0 }
 0xca6   :  { %v1185_v55 = vpop.f32.mrb[34].mxu0 }
 0xca7   :  { %v1186_v56 = vadd.f32 %v1185_v55, %v2364_v35  ;;  %v2035_v57 = vpop.f32.mrb[35].mxu0  ;;  %v1189_v58 = vsel %vm216_vm3, %v1183_v43, -inf }
 0xca8   :  { %1190 = vmax.xlane.f32.xlu0 %v1189_v58 }
 0xca9   :  { %v1192_v59 = vsel %vm216_vm3, %v1186_v56, -inf }
 0xcac   :  { %1193 = vmax.xlane.f32.xlu0 %v1192_v59  ;;  %v1300_v60 = vpop.f32.mrb[36].mxu0 }
 0xcad   :  { %v1301_v61 = vadd.f32 %v1300_v60, %v2358_v26  ;;  %v2046_v62 = vpop.f32.mrb[37].mxu0 }
 0xcae   :  { %v1303_v63 = vpop.f32.mrb[38].mxu0 }
 0xcaf   :  { %v1304_v2 = vadd.f32 %v1303_v63, %v2364_v35  ;;  %v2047_v3 = vpop.f32.mrb[39].mxu0  ;;  %v1307_v4 = vsel %vm216_vm3, %v1301_v61, -inf }
 0xcb0   :  { %1308 = vmax.xlane.f32.xlu1 %v1307_v4 }
 0xcb1   :  { %v1310_v5 = vsel %vm216_vm3, %v1304_v2, -inf }
 0xcb2   :  { %1311 = vmax.xlane.f32.xlu0 %v1310_v5 }
 0xcb4   :  { %v1416_v11 = vpop.f32.mrb[40].mxu0 }
 0xcb5   :  { %v1417_v12 = vadd.f32 %v1416_v11, %v2358_v26  ;;  %v2058_v13 = vpop.f32.mrb[41].mxu0 }
 0xcb6   :  { %v1419_v14 = vpop.f32.mrb[42].mxu0 }
 0xcb7   :  { %v1420_v15 = vadd.f32 %v1419_v14, %v2364_v35  ;;  %v2059_v16 = vpop.f32.mrb[43].mxu0  ;;  %v1423_v17 = vsel %vm216_vm3, %v1417_v12, -inf }
 0xcb8   :  { %1424 = vmax.xlane.f32.xlu1 %v1423_v17 }
 0xcb9   :  { %v1426_v18 = vsel %vm216_vm3, %v1420_v15, -inf }
 0xcba   :  { %1427 = vmax.xlane.f32.xlu0 %v1426_v18 }
 0xd2d   :  { %v1073_v19 = vpop.xlane.xlu0 %1072 }
 0xd2e   :  { %v1077_v21 = vsub.f32 %v1065_v46, %v1073_v19 }
 0xd2f   :  { %v1076_v22 = vpop.xlane.xlu1 %1075 }
 0xd30   :  { %v1079_v23 = vmul.f32 1.442695, %v1077_v21  ;;  %v1078_v24 = vsub.f32 %v1068_v49, %v1076_v22 }
 0xd32   :  { %2213 = vpow2.f32 %v1079_v23  ;;  %v1081_v27 = vmul.f32 1.442695, %v1078_v24 }
 0xd34   :  { %2215 = vpow2.f32 %v1081_v27 }
 0xd35   :  { %v1191_v26 = vpop.xlane.xlu0 %1190 }
 0xd36   :  { %v1195_v28 = vsub.f32 %v1183_v43, %v1191_v26 }
 0xd38   :  { %v1197_v29 = vmul.f32 1.442695, %v1195_v28 }
 0xd39   :  { %v1194_v30 = vpop.xlane.xlu0 %1193 }
 0xd3a   :  { %2217 = vpow2.f32 %v1197_v29  ;;  %v1196_v35 = vsub.f32 %v1186_v56, %v1194_v30 }
 0xd3c   :  { %v2214_v31 = vpop.eup %2213  ;;  %v1199_v32 = vmul.f32 1.442695, %v1196_v35 }
 0xd3d   :  { %v1309_v34 = vpop.xlane.xlu1 %1308  ;;  %v1083_v33 = vsel %vm216_vm3, %v2214_v31, 0.0 }
 0xd3e   :  { %v2216_v36 = vpop.eup %2215  ;;  %2219 = vpow2.f32 %v1199_v32  ;;  %v1313_v39 = vsub.f32 %v1301_v61, %v1309_v34  ;;  %1084 = vadd.xlane.f32.xlu1 %v1083_v33 }
 0xd3f   :  { %v1312_v37 = vpop.xlane.xlu0 %1311  ;;  %v1086_v38 = vsel %vm216_vm3, %v2216_v36, 0.0 }
 0xd40   :  { %v1315_v9 = vmul.f32 1.442695, %v1313_v39  ;;  %v1314_v10 = vsub.f32 %v1304_v2, %v1312_v37  ;;  %1087 = vadd.xlane.f32.xlu0 %v1086_v38 }
 0xd42   :  { %2221 = vpow2.f32 %v1315_v9  ;;  %v1317_v41 = vmul.f32 1.442695, %v1314_v10  ;;  %v2149_v10 = vld [vmem:[%s2729_s2 + $0x24] ss:$44 sps:$4 sm:$0xff]  }
 0xd43   :  { %2067 = vmatpush3.bf16.msra.mxu0 %v2149_v10 }
 0xd44   :  { %v2218_v42 = vpop.eup %2217  ;;  %2223 = vpow2.f32 %v1317_v41  ;;  %2068 = vmatprep.subr.bf16.mxu0 %v2261_v6 }
 0xd45   :  { %v1425_v44 = vpop.xlane.xlu1 %1424  ;;  %v1201_v45 = vsel %vm216_vm3, %v2218_v42, 0.0 }
 0xd46   :  { %v1429_v46 = vsub.f32 %v1417_v12, %v1425_v44  ;;  %1202 = vadd.xlane.f32.xlu1 %v1201_v45  ;;  %v2150_v45 = vld [vmem:[%s2729_s2 + $0x7c] ss:$44 sps:$4 sm:$0xff]  }
 0xd47   :  { %v1428_v0 = vpop.xlane.xlu0 %1427  ;;  %2069 = vmatpush3.bf16.msra.mxu0 %v2150_v45 }
 0xd48   :  { %v2220_v1 = vpop.eup %2219  ;;  %v1431_v49 = vmul.f32 1.442695, %v1429_v46  ;;  %v1430_v51 = vsub.f32 %v1420_v15, %v1428_v0  ;;  %2074 = vmatprep.subr.bf16.mxu0 %v2261_v6 }
 0xd49   :  { %v1204_v52 = vsel %vm216_vm3, %v2220_v1, 0.0 }
 0xd4a   :  { %2225 = vpow2.f32 %v1431_v49  ;;  %v1433_v53 = vmul.f32 1.442695, %v1430_v51  ;;  %1205 = vadd.xlane.f32.xlu0 %v1204_v52 }
 0xd4c   :  { %v2222_v40 = vpop.eup %2221  ;;  %2227 = vpow2.f32 %v1433_v53 }
 0xd4d   :  { %v1319_v43 = vsel %vm216_vm3, %v2222_v40, 0.0 }
 0xd4e   :  { %v2224_v54 = vpop.eup %2223  ;;  %1320 = vadd.xlane.f32.xlu1 %v1319_v43 }
 0xd4f   :  { %v1322_v55 = vsel %vm216_vm3, %v2224_v54, 0.0 }
 0xd50   :  { %1323 = vadd.xlane.f32.xlu0 %v1322_v55 }
 0xd54   :  { %v2226_v56 = vpop.eup %2225 }
 0xd55   :  { %v1435_v57 = vsel %vm216_vm3, %v2226_v56, 0.0 }
 0xd56   :  { %v2228_v58 = vpop.eup %2227  ;;  %1436 = vadd.xlane.f32.xlu1 %v1435_v57 }
 0xd57   :  { %v1438_v59 = vsel %vm216_vm3, %v2228_v58, 0.0 }
 0xd58   :  { %1439 = vadd.xlane.f32.xlu0 %v1438_v59 }
 0xd67   :  { %1095 = vrot.lane.b32.xlu1 %v2557_v20, %s2270_s10 }
 0xd6e   :  { %1330 = vrot.lane.b32.xlu0 %v2557_v20, %s2271_s11 }
 0xdcb   :  { %v1085_v61 = vpop.xlane.xlu1 %1084 }
 0xdcd   :  { %v1088_v60 = vpop.xlane.xlu0 %1087 }
 0xdce   :  { %2229 = vrcp.f32 %v1088_v60 }
 0xdcf   :  { %2231 = vrcp.f32 %v1085_v61 }
 0xdd3   :  { %v1203_v62 = vpop.xlane.xlu1 %1202 }
 0xdd7   :  { %v1206_v63 = vpop.xlane.xlu0 %1205 }
 0xdd8   :  { %2233 = vrcp.f32 %v1206_v63  ;;  %v2230_v3 = vpop.eup %2229 }
 0xdd9   :  { %2235 = vrcp.f32 %v1203_v62  ;;  %v2232_v5 = vpop.eup %2231  ;;  %v1092_v11 = vmul.f32 %v2230_v3, %v2216_v36 }
 0xdda   :  { %v1091_v13 = vmul.f32 %v2232_v5, %v2214_v31 }
 0xddb   :  { %v1321_v2 = vpop.xlane.xlu1 %1320 }
 0xddc   :  { %v1093_v15 = vpack.c.bf16 %v1092_v11, %v1091_v13 }
 0xddd   :  { %v1324_v12 = vpop.xlane.xlu0 %1323 }
 0xdde   :  { %2237 = vrcp.f32 %v1324_v12  ;;  %v896_v12 = vld [vmem:[%s2731_s3 + $0x10] ss:$0 sm:$0xff] }
 0xddf   :  { %2239 = vrcp.f32 %v1321_v2 }
 0xde2   :  { %v2234_v20 = vpop.eup %2233 }
 0xde3   :  { %v1437_v4 = vpop.xlane.xlu1 %1436  ;;  %v2236_v16 = vpop.eup %2235  ;;  %v1210_v17 = vmul.f32 %v2234_v20, %v2220_v1 }
 0xde4   :  { %v1209_v19 = vmul.f32 %v2236_v16, %v2218_v42 }
 0xde5   :  { %v1440_v18 = vpop.xlane.xlu0 %1439 }
 0xde6   :  { %2241 = vrcp.f32 %v1440_v18  ;;  %v1211_v21 = vpack.c.bf16 %v1210_v17, %v1209_v19 }
 0xde7   :  { %v1096_v14 = vpop.permute.xlu1 %1095  ;;  %2243 = vrcp.f32 %v1437_v4 }
 0xde8   :  { %2025 = vmatpush3.bf16.msra.mxu1 %v1096_v14  ;;  %v2238_v22 = vpop.eup %2237 }
 0xde9   :  { %2036 = vmatprep.subr.bf16.mxu1 %v2261_v6  ;;  %v1331_v23 = vpop.permute.xlu0 %1330  ;;  %v2240_v24 = vpop.eup %2239  ;;  %v1328_v27 = vmul.f32 %v2238_v22, %v2224_v54 }
 0xdea   :  { %v1327_v26 = vmul.f32 %v2240_v24, %v2222_v40 }
 0xdeb   :  { %2027 = vmatmul.mubr.msk.bf16.vlgmr.msra.gmra.mrb[24].mxu1 %vm216_vm3, %v1093_v15 }
 0xdec   :  { %2037 = vmatpush3.bf16.msra.mxu1 %v1096_v14  ;;  %2038 = vmatprep.mubr.msk.bf16.mxu1 %vm2262_vm1, %v2261_v6  ;;  %v1329_v28 = vpack.c.bf16 %v1328_v27, %v1327_v26  ;;  %v2154_v27 = vld [vmem:[%s2729_s2 + $0x70] ss:$44 sps:$4 sm:$0xff]   ;;  %v2156_v26 = vld [vmem:[%s2729_s2 + $0x74] ss:$44 sps:$4 sm:$0xff]  }
 0xded   :  { %2048 = vmatprep.subr.bf16.mxu1 %v2261_v6 }
 0xdf0   :  { %v2242_v29 = vpop.eup %2241 }
 0xdf1   :  { %v2244_v30 = vpop.eup %2243  ;;  %v1444_v35 = vmul.f32 %v2242_v29, %v2228_v58 }
 0xdf2   :  { %v1443_v31 = vmul.f32 %v2244_v30, %v2226_v56 }
 0xdf3   :  { %2039 = vmatmul.mubr.msk.bf16.vlgmr.msra.gmra.mrb[28].mxu1 %vm216_vm3, %v1211_v21 }
 0xdf4   :  { %2049 = vmatpush3.bf16.msra.mxu1 %v1331_v23  ;;  %2050 = vmatprep.mubr.msk.bf16.mxu1 %vm2262_vm1, %v2261_v6  ;;  %v1445_v32 = vpack.c.bf16 %v1444_v35, %v1443_v31 }
 0xdf5   :  { %2060 = vmatprep.subr.bf16.mxu1 %v2261_v6 }
 0xdfb   :  { %2051 = vmatmul.mubr.msk.bf16.vlgmr.msra.gmra.mrb[32].mxu1 %vm216_vm3, %v1329_v28 }
 0xdfc   :  { %2061 = vmatpush3.bf16.msra.mxu1 %v1331_v23  ;;  %2062 = vmatprep.mubr.msk.bf16.mxu1 %vm2262_vm1, %v2261_v6 }
 0xe03   :  { %2063 = vmatmul.mubr.msk.bf16.vlgmr.msra.gmra.mrb[36].mxu1 %vm216_vm3, %v1445_v32 }
 0xe04   :  { %1664 = vmatprep.mubr.bf16.mxu1 %v2275_v50 }
 0xebe   :  { %v1135_v34 = vpop.f32.mrb[24].mxu1 }
 0xebf   :  { %v2028_v33 = vpop.f32.mrb[25].mxu1 }
 0xec0   :  { %v1138_v36 = vpop.f32.mrb[26].mxu1 }
 0xec1   :  { %v2029_v39 = vpop.f32.mrb[27].mxu1 }
 0xec2   :  { %v897_v39 = vld [vmem:[%s2731_s3 + $0x11] ss:$0 sm:$0xff] }
 0xec6   :  { %v1249_v37 = vpop.f32.mrb[28].mxu1 }
 0xec7   :  { %v2040_v38 = vpop.f32.mrb[29].mxu1 }
 0xec8   :  { %v1252_v9 = vpop.f32.mrb[30].mxu1 }
 0xec9   :  { %v2120_v41 = vpack.i.bf16 %v1252_v9, %v1249_v37  ;;  %v2041_v42 = vpop.f32.mrb[31].mxu1 }
 0xeca   :  { %v2158_v42 = vld [vmem:[%s2729_s2 + $0x78] ss:$44 sps:$4 sm:$0xff]  }
 0xecb   :  { %2121 = vrot.lane.b32.xlu1 %v2120_v41, %s2272_s14  ;;  %v2157_v41 = vld [vmem:[%s2729_s2 + $0x20] ss:$44 sps:$4 sm:$0xff]  }
 0xece   :  { %v1370_v44 = vpop.f32.mrb[32].mxu1 }
 0xecf   :  { %v2052_v50 = vpop.f32.mrb[33].mxu1 }
 0xed0   :  { %v1373_v46 = vpop.f32.mrb[34].mxu1 }
 0xed1   :  { %v2125_v0 = vpack.i.bf16 %v1373_v46, %v1370_v44  ;;  %v2053_v1 = vpop.f32.mrb[35].mxu1  ;;  %v1858_v44 = vld [vmem:[%s2731_s3 + $0x12] ss:$8 sm:$0x3] }
 0xed2   :  { %v1606_v50 = vrot.slane %v1858_v44, %v752_v8 }
 0xed3   :  { %2126 = vrot.lane.b32.xlu1 %v2125_v0, %s2273_s17 }
 0xed6   :  { %v1483_v49 = vpop.f32.mrb[36].mxu1 }
 0xed7   :  { %v2064_v51 = vpop.f32.mrb[37].mxu1 }
 0xed8   :  { %v1486_v52 = vpop.f32.mrb[38].mxu1 }
 0xed9   :  { %v2130_v53 = vpack.i.bf16 %v1486_v52, %v1483_v49  ;;  %v2065_v40 = vpop.f32.mrb[39].mxu1 }
 0xedb   :  { %2131 = vrot.lane.b32.xlu0 %v2130_v53, %s2274_s18 }
 0xf3d   :  { %v2122_v43 = vpop.permute.xlu1 %2121 }
 0xf3e   :  { %v2124_v55 = vunpack.i.h.bf16 %v2122_v43  ;;  %v2123_v56 = vunpack.i.l.bf16 %v2122_v43 }
 0xf40   :  { %v1515_v60 = vsel %vm168_vm2, %v1138_v36, %v2124_v55  ;;  %v1514_v61 = vsel %vm168_vm2, %v1135_v34, %v2123_v56  ;;  %v1602_v56 = vrot.slane %v1858_v44, %v748_v25 }
 0xf45   :  { %v2127_v54 = vpop.permute.xlu1 %2126 }
 0xf46   :  { %v2129_v57 = vunpack.i.h.bf16 %v2127_v54  ;;  %v2128_v58 = vunpack.i.l.bf16 %v2127_v54 }
 0xf48   :  { %v1517_v2 = vsel %vm216_vm3, %v1515_v60, %v2129_v57  ;;  %v1516_v3 = vsel %vm216_vm3, %v1514_v61, %v2128_v58 }
 0xf4d   :  { %v2132_v59 = vpop.permute.xlu0 %2131 }
 0xf4e   :  { %v2134_v62 = vunpack.i.h.bf16 %v2132_v59  ;;  %v2133_v63 = vunpack.i.l.bf16 %v2132_v59 }
 0xf50   :  { %v1519_v4 = vsel %vm664_vm4, %v1517_v2, %v2134_v62  ;;  %v1518_v5 = vsel %vm664_vm4, %v1516_v3, %v2133_v63  ;;  %v900_v3 = vld [vmem:[%s2731_s3 + $0x13] ss:$0 sm:$0xff] }
 0xf51   :  { %v1520_v11 = vpack.c.bf16 %v1519_v4, %v1518_v5 }
 0xf53   :  { %2071 = vmatmul.mubr.msk.bf16.vlgmr.msra.gmra.mrb[44].mxu0 %vm47_vm0, %v1520_v11 }
 0xf54   :  { %2078 = vmatprep.mubr.msk.bf16.mxu0 %vm2262_vm1, %v2261_v6  ;;  %2075 = vmatpush3.bf16.xpose.msra.mxu0 %v2157_v41 }
 0xf55   :  { %2076 = vmatprep.subr.bf16.mxu0 %v2261_v6 }
 0xf5c   :  { %2077 = vmatpush3.bf16.xpose.msra.mxu0 %v2158_v42 }
0x1026   :  { %v1570_v13 = vpop.f32.mrb[44].mxu0 }
0x1027   :  { %v1571_v14 = vadd.f32 %v1570_v13, %v896_v12  ;;  %v2072_v15 = vpop.f32.mrb[45].mxu0 }
0x1028   :  { %v1573_v20 = vpop.f32.mrb[46].mxu0 }
0x1029   :  { %v2655_v16 = vadd.f32 %v1571_v14, %v2524_v47  ;;  %v1574_v17 = vadd.f32 %v1573_v20, %v896_v12  ;;  %v2073_v18 = vpop.f32.mrb[47].mxu0  ;;  %v2153_v47 = vld [vmem:[%s2729_s2 + $0x1c] ss:$44 sps:$4 sm:$0xff]  }
0x102a   :  { %1632 = vmatprep.subr.bf16.mxu1 %v2153_v47 }
0x102b   :  { %v2658_v19 = vadd.f32 %v1574_v17, %v2527_v48  ;;  %v1579_v21 = vmul.f32 %v2655_v16, %v2655_v16  ;;  %v2151_v48 = vld [vmem:[%s2729_s2 + $0x18] ss:$44 sps:$4 sm:$0xff]  }
0x102c   :  { %1633 = vmatpush1.bf16.msra.mxu1 %v2151_v48 }
0x102d   :  { %v1581_v22 = vsel %vm47_vm0, %v1579_v21, 0.0  ;;  %v1580_v23 = vmul.f32 %v2658_v19, %v2658_v19  ;;  %1634 = vmatprep.subr.bf16.mxu1 %v2156_v26  ;;  %v2159_v21 = vld [vmem:[%s2729_s2 + $0x28] ss:$44 sps:$4 sm:$0xff]  }
0x102e   :  { %1582 = vadd.xlane.f32.xlu1 %v1581_v22 }
0x102f   :  { %v1584_v24 = vsel %vm47_vm0, %v1580_v23, 0.0 }
0x1030   :  { %1585 = vadd.xlane.f32.xlu0 %v1584_v24  ;;  %1635 = vmatpush1.bf16.msra.mxu1 %v2154_v27 }
0x1031   :  { %2082 = vmatprep.subr.bf16.mxu1 %v2261_v6 }
0x10bb   :  { %v1583_v28 = vpop.xlane.xlu1 %1582 }
0x10bc   :  { %v1587_v29 = vmul.f32 0.03125, %v1583_v28 }
0x10bd   :  { %v1586_v30 = vpop.xlane.xlu0 %1585 }
0x10be   :  { %v1589_v35 = vadd.f32 1.1920929e-07, %v1587_v29  ;;  %v1588_v31 = vmul.f32 0.03125, %v1586_v30 }
0x10c0   :  { %2245 = vrsqrt.f32 %v1589_v35  ;;  %v1590_v32 = vadd.f32 1.1920929e-07, %v1588_v31 }
0x10c2   :  { %2247 = vrsqrt.f32 %v1590_v32  ;;  %v1748_v32 = vld [vmem:[%s2731_s3 + $0x15] ss:$0 sm:$0xff] }
0x10ca   :  { %v2246_v34 = vpop.eup %2245 }
0x10cb   :  { %v1593_v33 = vmul.f32 %v2246_v34, %v2655_v16 }
0x10cc   :  { %v2248_v36 = vpop.eup %2247 }
0x10cd   :  { %v1594_v37 = vmul.f32 %v2248_v36, %v2658_v19  ;;  %v1595_v38 = vmul.f32 %v1593_v33, %v897_v39 }
0x10cf   :  { %v1596_v9 = vmul.f32 %v1594_v37, %v897_v39 }
0x10d1   :  { %v1597_v10 = vpack.c.bf16 %v1596_v9, %v1595_v38 }
0x10d3   :  { %1877 = vmatmul.mubr.msk.bf16.vlgmr.msra.gmra.mrb[40].mxu1 %vm47_vm0, %v1597_v10 }
0x10d4   :  { %2086 = vmatprep.mubr.msk.bf16.mxu1 %vm2262_vm1, %v2261_v6  ;;  %2083 = vmatpush3.bf16.msra.mxu1 %v2159_v21 }
0x10d5   :  { %2084 = vmatprep.subr.bf16.mxu1 %v2261_v6  ;;  %v1747_v6 = vld [vmem:[%s2731_s3 + $0x14] ss:$0 sm:$0xff] }
0x11a6   :  { %v1666_v45 = vpop.f32.mrb[40].mxu1 }
0x11a7   :  { %v1668_v46 = vpop.f32.mrb[41].mxu1  ;;  %v1667_v57 = vadd.f32 %v1666_v45, %v1602_v56 }
0x11a8   :  { %v1669_v0 = vadd.f32 %v1668_v46, %v1606_v50  ;;  %v1670_v1 = vpop.f32.mrb[42].mxu1 }
0x11a9   :  { %v1672_v49 = vpop.f32.mrb[43].mxu1  ;;  %v1671_v61 = vadd.f32 %v1670_v1, %v1602_v56 }
0x11aa   :  { %v1878_v51 = vmul.f32 -1.442695, %v1669_v0  ;;  %v1673_v52 = vadd.f32 %v1672_v49, %v1606_v50 }
0x11ac   :  { %2249 = vpow2.f32 %v1878_v51  ;;  %v1879_v53 = vmul.f32 -1.442695, %v1673_v52 }
0x11ae   :  { %2251 = vpow2.f32 %v1879_v53 }
0x11b6   :  { %v2250_v40 = vpop.eup %2249 }
0x11b7   :  { %v1681_v43 = vadd.f32 1.0, %v2250_v40 }
0x11b8   :  { %v2252_v54 = vpop.eup %2251 }
0x11b9   :  { %2253 = vrcp.f32 %v1681_v43  ;;  %v1682_v55 = vadd.f32 1.0, %v2252_v54 }
0x11bb   :  { %2255 = vrcp.f32 %v1682_v55 }
0x11c3   :  { %v2254_v8 = vpop.eup %2253 }
0x11c4   :  { %v1687_v58 = vmul.f32 %v2254_v8, %v1669_v0 }
0x11c5   :  { %v2256_v59 = vpop.eup %2255 }
0x11c6   :  { %v1689_v60 = vmul.f32 %v1687_v58, %v1667_v57  ;;  %v1688_v62 = vmul.f32 %v2256_v59, %v1673_v52 }
0x11c8   :  { %v1690_v63 = vmul.f32 %v1688_v62, %v1671_v61 }
0x11ca   :  { %v1691_v2 = vpack.c.bf16 %v1690_v63, %v1689_v60 }
0x11cc   :  { %2079 = vmatmul.mubr.bf16.vlgmr.msra.gmra.mrb[48].mxu0 %v1691_v2 }
0x129f   :  { %v1738_v4 = vpop.f32.mrb[48].mxu0 }
0x12a0   :  { %v1739_v5 = vadd.f32 %v1738_v4, %v900_v3  ;;  %v2080_v11 = vpop.f32.mrb[49].mxu0 }
0x12a1   :  { %v1741_v12 = vpop.f32.mrb[50].mxu0 }
0x12a2   :  { %v1745_v7 = vadd.f32 %v1739_v5, %v2655_v16  ;;  %v1742_v25 = vadd.f32 %v1741_v12, %v900_v3  ;;  %v2081_v13 = vpop.f32.mrb[51].mxu0  ;;  %v2160_v16 = vld [vmem:[%s2729_s2 + $0x80] ss:$44 sps:$4 sm:$0xff]  }
0x12a3   :  { %2085 = vmatpush3.bf16.msra.mxu1 %v2160_v16 }
0x12a4   :  { %v1746_v14 = vadd.f32 %v1742_v25, %v2658_v19  ;;  %v1753_v15 = vmul.f32 %v1745_v7, %v1745_v7 }
0x12a6   :  { %v1755_v20 = vsel %vm47_vm0, %v1753_v15, 0.0  ;;  %v1754_v17 = vmul.f32 %v1746_v14, %v1746_v14 }
0x12a7   :  { %1756 = vadd.xlane.f32.xlu0 %v1755_v20 }
0x12a8   :  { %v1758_v18 = vsel %vm47_vm0, %v1754_v17, 0.0 }
0x12a9   :  { %1759 = vadd.xlane.f32.xlu1 %v1758_v18 }
0x1334   :  { %v1757_v19 = vpop.xlane.xlu0 %1756 }
0x1335   :  { %v1761_v22 = vmul.f32 0.03125, %v1757_v19 }
0x1336   :  { %v1760_v23 = vpop.xlane.xlu1 %1759 }
0x1337   :  { %v1763_v24 = vadd.f32 1.1920929e-07, %v1761_v22  ;;  %v1762_v47 = vmul.f32 0.03125, %v1760_v23 }
0x1339   :  { %2257 = vrsqrt.f32 %v1763_v24  ;;  %v1764_v48 = vadd.f32 1.1920929e-07, %v1762_v47 }
0x133b   :  { %2259 = vrsqrt.f32 %v1764_v48 }
0x1343   :  { %v2258_v27 = vpop.eup %2257 }
0x1344   :  { %v1767_v26 = vmul.f32 %v2258_v27, %v1745_v7 }
0x1345   :  { %v2260_v28 = vpop.eup %2259 }
0x1346   :  { %v1768_v29 = vmul.f32 %v2260_v28, %v1746_v14  ;;  %v1769_v30 = vmul.f32 %v1767_v26, %v1747_v6 }
0x1348   :  { %v1770_v35 = vmul.f32 %v1768_v29, %v1747_v6 }
0x134a   :  { %v1771_v31 = vpack.c.bf16 %v1770_v35, %v1769_v30 }
0x134c   :  { %2087 = vmatmul.mubr.msk.bf16.vlgmr.msra.gmra.mrb[44].mxu1 %vm47_vm0, %v1771_v31 }
0x141f   :  { %v1821_v34 = vpop.f32.mrb[44].mxu1 }
0x1420   :  { %v1822_v33 = vadd.f32 %v1821_v34, %v1748_v32  ;;  %v2088_v36 = vpop.f32.mrb[45].mxu1 }
0x1421   :  { %v1824_v39 = vpop.f32.mrb[46].mxu1 }
0x1422   :  { %1828 = vst [vmem:[%s2732_s4] sm:$0xff] %v1822_v33  ;;  %v1825_v37 = vadd.f32 %v1824_v39, %v1748_v32  ;;  %v2089_v38 = vpop.f32.mrb[47].mxu1 }
0x1424   :  { %1829 = vst [vmem:[%s2732_s4 + $0x8] sm:$0xff] %v1825_v37 }

</bundles_post_ra>
